<compile_context>
chip_gen: v5e
topology: v5e:2x2
jax: 0.10.0
libtpu: 0.0.40
codegen_flags: <defaults>
</compile_context>

<pallas_src>
import math

import jax
import jax.numpy as jnp
from jax.experimental import pallas as pl
from jax.experimental.pallas import tpu as pltpu


# ------------------------------- Pallas kernel --------------------------------

def _lenet5_fused_kernel(x_ref, t1c_ref, p1r_ref, p1c_ref, t2_ref, b2row_ref,
                         p2r_ref, p2c_ref, aw1_ref, b1r_ref, w2t_ref, bf2_ref,
                         w3t_ref, bf3_ref, o_ref):
    f32 = jnp.float32

    def dot(a, b):
        return jnp.dot(a, b, preferred_element_type=f32)

    # ---- conv1 (+bias) : 5 Toeplitz matmuls covering all 6 channels ----------
    # r1[i, 28*ci + j] = relu(conv1)[ci, i, j]
    acc1 = dot(x_ref[0, 0:28, :], t1c_ref[0])
    for di in range(1, 5):
        acc1 = acc1 + dot(x_ref[0, di:di + 28, :], t1c_ref[di])
    r1 = jnp.maximum(acc1, 0.0)                                        # (28, 168)

    # ---- pool1 : 2x2/2 max via 0/1 selector matmuls ---------------------------
    rmax = jnp.maximum(dot(p1r_ref[0], r1), dot(p1r_ref[1], r1))       # (14, 168)
    p1 = jnp.maximum(dot(rmax, p1c_ref[0]), dot(rmax, p1c_ref[1]))     # (14, 84)
    # p1[h, 14*ci + w] = pool1[ci, h, w]

    # ---- conv2 (+bias, relu) : 5 Toeplitz matmuls summed over kernel row -----
    # r2[m, 10*co + n] = relu(conv2)[co, m, n]
    acc2 = dot(p1[0:10, :], t2_ref[0])
    for ei in range(1, 5):
        acc2 = acc2 + dot(p1[ei:ei + 10, :], t2_ref[ei])
    r2 = jnp.maximum(acc2 + b2row_ref[...], 0.0)                       # (10, 160)

    # ---- pool2 : 2x2/2 max via 0/1 selector matmuls ---------------------------
    rp = jnp.maximum(dot(p2r_ref[0], r2), dot(p2r_ref[1], r2))         # (5, 160)
    p2 = jnp.maximum(dot(rp, p2c_ref[0]), dot(rp, p2c_ref[1]))         # (5, 80)
    # p2[g, 5*co + n'] = pool2[co, g, n']

    # ---- adaptive avg pool (1,1) folded into fc1; lane-dense FC head ---------
    colsum = jnp.sum(p2, axis=0, keepdims=True)                        # (1, 80)
    h = jnp.maximum(dot(colsum, aw1_ref[...]) + b1r_ref[...], 0.0)     # (1, 128)
    h = jnp.maximum(dot(h, w2t_ref[...]) + bf2_ref[...], 0.0)          # (1, 128)
    out = dot(h, w3t_ref[...]) + bf3_ref[...]                          # (1, 128)

    o_ref[0] = out[:, :10]


# ---------------------- one-time parameter preparation ------------------------

def prepare_params(params):
    """Hoisted weight prep: every matrix the kernel needs is built once here."""
    f32 = jnp.float32

    # conv1 -> per-di Toeplitz over the W axis, all 6 channels side by side.
    # t1c[di, w, 28*ci + j] = w1[ci, di, w - j]  (bias folded via ones column).
    w1 = params["conv1_w"].astype(f32)[:, 0]                 # (6, 5, 5) [ci, di, dj]
    b1 = params["conv1_b"].astype(f32)                       # (6,)
    w_idx = jnp.arange(33)[:, None]                          # input col (incl. ones)
    j_idx = jnp.arange(28)[None, :]                          # conv1 output col
    dj = w_idx - j_idx
    valid = (dj >= 0) & (dj < 5) & (w_idx < 32)
    t1 = jnp.where(valid[None, None], w1[:, :, jnp.clip(dj, 0, 4)], 0.0)  # (6,5,33,28)
    t1 = t1.at[:, 0, 32, :].set(b1[:, None])                 # bias row, only di == 0
    t1c = jnp.transpose(t1, (1, 2, 0, 3)).reshape(5, 33, 6 * 28)          # (5,33,168)

    # pool1 selectors (rows: stride-2 pick; cols: block-diagonal per channel).
    h_i = jnp.arange(14)[:, None]
    i_i = jnp.arange(28)[None, :]
    p1row = jnp.stack([i_i == 2 * h_i, i_i == 2 * h_i + 1]).astype(f32)   # (2,14,28)
    r_i = jnp.arange(168)
    c_i = jnp.arange(84)
    ci_r, cc_r = r_i // 28, r_i % 28
    ci_c, w_c = c_i // 14, c_i % 14
    same = ci_r[:, None] == ci_c[None, :]
    p1col = jnp.stack([same & (cc_r[:, None] == 2 * w_c[None, :]),
                       same & (cc_r[:, None] == 2 * w_c[None, :] + 1)]
                      ).astype(f32)                                        # (2,168,84)

    # conv2 -> per-ei Toeplitz: rows (14*ci + u), cols (10*co + n).
    w2 = params["conv2_w"].astype(f32)                        # (16, 6, 5, 5)
    u_idx = jnp.arange(14)[:, None]
    n_idx = jnp.arange(10)[None, :]
    ej = u_idx - n_idx
    valid2 = (ej >= 0) & (ej < 5)
    wg = jnp.where(valid2[None, None, None],
                   w2[:, :, :, jnp.clip(ej, 0, 4)], 0.0)      # (16,6,5,14,10)
    t2 = jnp.transpose(wg, (2, 1, 3, 0, 4)).reshape(5, 6 * 14, 16 * 10)   # (5,84,160)
    b2row = jnp.repeat(params["conv2_b"].astype(f32), 10)[None, :]        # (1,160)

    # pool2 selectors.
    g_i = jnp.arange(5)[:, None]
    m_i = jnp.arange(10)[None, :]
    p2row = jnp.stack([m_i == 2 * g_i, m_i == 2 * g_i + 1]).astype(f32)   # (2,5,10)
    r2i = jnp.arange(160)
    c2i = jnp.arange(80)
    co_r, n_r = r2i // 10, r2i % 10
    co_c, np_c = c2i // 5, c2i % 5
    same2 = co_r[:, None] == co_c[None, :]
    p2col = jnp.stack([same2 & (n_r[:, None] == 2 * np_c[None, :]),
                       same2 & (n_r[:, None] == 2 * np_c[None, :] + 1)]
                      ).astype(f32)                                        # (2,160,80)

    # Adaptive (1,1) avg pool folded into fc1; FC head padded to 128 lanes.
    aw1 = jnp.repeat(params["fc1_w"].astype(f32).T / 25.0, 5, axis=0)      # (80,120)
    aw1 = jnp.zeros((80, 128), f32).at[:, :120].set(aw1)
    b1r = jnp.zeros((1, 128), f32).at[0, :120].set(params["fc1_b"].astype(f32))
    w2t = jnp.zeros((128, 128), f32).at[:120, :84].set(params["fc2_w"].astype(f32).T)
    b2r = jnp.zeros((1, 128), f32).at[0, :84].set(params["fc2_b"].astype(f32))
    w3t = jnp.zeros((128, 128), f32).at[:84, :10].set(params["fc3_w"].astype(f32).T)
    b3r = jnp.zeros((1, 128), f32).at[0, :10].set(params["fc3_b"].astype(f32))

    return dict(t1c=t1c, p1row=p1row, p1col=p1col, t2=t2, b2row=b2row,
                p2row=p2row, p2col=p2col, aw1=aw1, b1r=b1r,
                w2t=w2t, b2r=b2r, w3t=w3t, b3r=b3r)


# --------------------------------- forward ------------------------------------

def lenet5_forward(x, prep):
    # x: (B, 1, 32, 32) NCHW (classic LeNet-5 input).
    B = x.shape[0]
    assert x.shape[1:] == (1, 32, 32), x.shape   # pools need even extents (28, 10)
    xa = jnp.concatenate(
        [x.reshape(B, 32, 32).astype(jnp.float32),
         jnp.ones((B, 32, 1), jnp.float32)], axis=-1)          # (B, 32, 33)

    def full(shape):
        return pl.BlockSpec(shape, lambda b, _n=len(shape): (0,) * _n)

    out = pl.pallas_call(
        _lenet5_fused_kernel,
        out_shape=jax.ShapeDtypeStruct((B, 1, 10), jnp.float32),
        grid=(B,),
        in_specs=[
            pl.BlockSpec((1, 32, 33), lambda b: (b, 0, 0)),    # input sample
            full((5, 33, 168)),                                # conv1 Toeplitz
            full((2, 14, 28)),                                 # pool1 row selectors
            full((2, 168, 84)),                                # pool1 col selectors
            full((5, 84, 160)),                                # conv2 Toeplitz
            full((1, 160)),                                    # conv2 bias row
            full((2, 5, 10)),                                  # pool2 row selectors
            full((2, 160, 80)),                                # pool2 col selectors
            full((80, 128)),                                   # avgpool ∘ fc1 weight
            full((1, 128)),                                    # fc1 bias
            full((128, 128)),                                  # fc2 weight
            full((1, 128)),                                    # fc2 bias
            full((128, 128)),                                  # fc3 weight
            full((1, 128)),                                    # fc3 bias
        ],
        out_specs=pl.BlockSpec((1, 1, 10), lambda b: (b, 0, 0)),
        compiler_params=pltpu.CompilerParams(
            dimension_semantics=("parallel",)),
    )(xa, prep["t1c"], prep["p1row"], prep["p1col"], prep["t2"], prep["b2row"],
      prep["p2row"], prep["p2col"], prep["aw1"], prep["b1r"],
      prep["w2t"], prep["b2r"], prep["w3t"], prep["b3r"])
    return out.reshape(B, 10)


# ----------------------- reference + parameter init ---------------------------

def lenet5_reference(x, params):
    def conv(z, w, b):
        y = jax.lax.conv_general_dilated(
            z, w, (1, 1), "VALID", dimension_numbers=("NCHW", "OIHW", "NCHW"))
        return y + b[None, :, None, None]

    y = jax.nn.relu(conv(x, params["conv1_w"], params["conv1_b"]))
    y = jax.lax.reduce_window(y, -jnp.inf, jax.lax.max, (1, 1, 2, 2), (1, 1, 2, 2), "VALID")
    y = jax.nn.relu(conv(y, params["conv2_w"], params["conv2_b"]))
    y = jax.lax.reduce_window(y, -jnp.inf, jax.lax.max, (1, 1, 2, 2), (1, 1, 2, 2), "VALID")
    y = y.mean(axis=(2, 3))                                        # adaptive (1,1) + flatten
    y = jax.nn.relu(y @ params["fc1_w"].T + params["fc1_b"])
    y = jax.nn.relu(y @ params["fc2_w"].T + params["fc2_b"])
    return y @ params["fc3_w"].T + params["fc3_b"]


def init_params(key):
    keys = jax.random.split(key, 10)

    def u(k, shape, fan_in):
        bound = 1.0 / math.sqrt(fan_in)
        return jax.random.uniform(k, shape, jnp.float32, minval=-bound, maxval=bound)

    return {
        "conv1_w": u(keys[0], (6, 1, 5, 5), 25),
        "conv1_b": u(keys[1], (6,), 25),
        "conv2_w": u(keys[2], (16, 6, 5, 5), 150),
        "conv2_b": u(keys[3], (16,), 150),
        "fc1_w": u(keys[4], (120, 16), 16),
        "fc1_b": u(keys[5], (120,), 16),
        "fc2_w": u(keys[6], (84, 120), 120),
        "fc2_b": u(keys[7], (84,), 120),
        "fc3_w": u(keys[8], (10, 84), 84),
        "fc3_b": u(keys[9], (10,), 84),
    }


if __name__ == "__main__":
    key = jax.random.PRNGKey(0)
    pkey, xkey = jax.random.split(key)
    params = init_params(pkey)
    prep = prepare_params(params)          # one-time, hoisted weight layout prep
    # classic LeNet-5 input: batch=2, 1 channel, 32x32
    x = jax.random.normal(xkey, (2, 1, 32, 32), dtype=jnp.float32)

    fwd = jax.jit(lenet5_forward)
    out = jax.block_until_ready(fwd(x, prep))
    assert out.shape == (2, 10), out.shape

    ref = lenet5_reference(x, params)
    if not jnp.allclose(out, ref, rtol=2e-2, atol=2e-2):
        raise AssertionError(
            f"mismatch vs reference, max abs diff = {float(jnp.max(jnp.abs(out - ref)))}")

    print("KERNEL_OK")
</pallas_src>

<mosaic_0001>
module attributes {stable_mosaic.version = 11 : i64} {
  func.func @_lenet5_fused_kernel(%arg0: i32, %arg1: memref<1x32x33xf32, #tpu.memory_space<vmem>>, %arg2: memref<5x33x168xf32, #tpu.memory_space<vmem>>, %arg3: memref<2x14x28xf32, #tpu.memory_space<vmem>>, %arg4: memref<2x168x84xf32, #tpu.memory_space<vmem>>, %arg5: memref<5x84x160xf32, #tpu.memory_space<vmem>>, %arg6: memref<1x160xf32, #tpu.memory_space<vmem>>, %arg7: memref<2x5x10xf32, #tpu.memory_space<vmem>>, %arg8: memref<2x160x80xf32, #tpu.memory_space<vmem>>, %arg9: memref<80x128xf32, #tpu.memory_space<vmem>>, %arg10: memref<1x128xf32, #tpu.memory_space<vmem>>, %arg11: memref<128x128xf32, #tpu.memory_space<vmem>>, %arg12: memref<1x128xf32, #tpu.memory_space<vmem>>, %arg13: memref<128x128xf32, #tpu.memory_space<vmem>>, %arg14: memref<1x128xf32, #tpu.memory_space<vmem>>, %arg15: memref<1x1x10xf32, #tpu.memory_space<vmem>>) attributes {dimension_semantics = [#tpu.dimension_semantics<parallel>], iteration_bounds = array<i64: 2>, scalar_prefetch = 0 : i64, scratch_operands = 0 : i64, tpu.core_type = #tpu.core_type<tc>, window_params = [{transform_indices = @transform_0, window_bounds = array<i64: 1, 32, 33>}, {pipeline_mode = #tpu.pipeline_mode<synchronous>, transform_indices = @transform_1, window_bounds = array<i64: 5, 33, 168>}, {pipeline_mode = #tpu.pipeline_mode<synchronous>, transform_indices = @transform_2, window_bounds = array<i64: 2, 14, 28>}, {pipeline_mode = #tpu.pipeline_mode<synchronous>, transform_indices = @transform_3, window_bounds = array<i64: 2, 168, 84>}, {pipeline_mode = #tpu.pipeline_mode<synchronous>, transform_indices = @transform_4, window_bounds = array<i64: 5, 84, 160>}, {pipeline_mode = #tpu.pipeline_mode<synchronous>, transform_indices = @transform_5, window_bounds = array<i64: 1, 160>}, {pipeline_mode = #tpu.pipeline_mode<synchronous>, transform_indices = @transform_6, window_bounds = array<i64: 2, 5, 10>}, {pipeline_mode = #tpu.pipeline_mode<synchronous>, transform_indices = @transform_7, window_bounds = array<i64: 2, 160, 80>}, {pipeline_mode = #tpu.pipeline_mode<synchronous>, transform_indices = @transform_8, window_bounds = array<i64: 80, 128>}, {pipeline_mode = #tpu.pipeline_mode<synchronous>, transform_indices = @transform_9, window_bounds = array<i64: 1, 128>}, {pipeline_mode = #tpu.pipeline_mode<synchronous>, transform_indices = @transform_10, window_bounds = array<i64: 128, 128>}, {pipeline_mode = #tpu.pipeline_mode<synchronous>, transform_indices = @transform_11, window_bounds = array<i64: 1, 128>}, {pipeline_mode = #tpu.pipeline_mode<synchronous>, transform_indices = @transform_12, window_bounds = array<i64: 128, 128>}, {pipeline_mode = #tpu.pipeline_mode<synchronous>, transform_indices = @transform_13, window_bounds = array<i64: 1, 128>}, {transform_indices = @transform_14, window_bounds = array<i64: 1, 1, 10>}]} {
    %c0 = arith.constant 0 : index
    %c0_0 = arith.constant 0 : index
    %c0_1 = arith.constant 0 : index
    %0 = vector.load %arg1[%c0, %c0_0, %c0_1] : memref<1x32x33xf32, #tpu.memory_space<vmem>>, vector<1x28x33xf32>
    %1 = vector.shape_cast %0 : vector<1x28x33xf32> to vector<28x33xf32>
    %c0_2 = arith.constant 0 : index
    %c0_3 = arith.constant 0 : index
    %c0_4 = arith.constant 0 : index
    %2 = vector.load %arg2[%c0_2, %c0_3, %c0_4] : memref<5x33x168xf32, #tpu.memory_space<vmem>>, vector<1x33x168xf32>
    %3 = vector.shape_cast %2 : vector<1x33x168xf32> to vector<33x168xf32>
    %cst = arith.constant dense<0.000000e+00> : vector<28x168xf32>
    %4 = tpu.matmul %1, %3, %cst {dimension_numbers = #tpu.dot_dimension_numbers<[1], [0], [0], [1], [0, 0, 1, 1], [], []>} : vector<28x33xf32>, vector<33x168xf32>, vector<28x168xf32> -> vector<28x168xf32>
    %c0_5 = arith.constant 0 : index
    %c1 = arith.constant 1 : index
    %c0_6 = arith.constant 0 : index
    %5 = vector.load %arg1[%c0_5, %c1, %c0_6] : memref<1x32x33xf32, #tpu.memory_space<vmem>>, vector<1x28x33xf32>
    %6 = vector.shape_cast %5 : vector<1x28x33xf32> to vector<28x33xf32>
    %c1_7 = arith.constant 1 : index
    %c0_8 = arith.constant 0 : index
    %c0_9 = arith.constant 0 : index
    %7 = vector.load %arg2[%c1_7, %c0_8, %c0_9] : memref<5x33x168xf32, #tpu.memory_space<vmem>>, vector<1x33x168xf32>
    %8 = vector.shape_cast %7 : vector<1x33x168xf32> to vector<33x168xf32>
    %cst_10 = arith.constant dense<0.000000e+00> : vector<28x168xf32>
    %9 = tpu.matmul %6, %8, %cst_10 {dimension_numbers = #tpu.dot_dimension_numbers<[1], [0], [0], [1], [0, 0, 1, 1], [], []>} : vector<28x33xf32>, vector<33x168xf32>, vector<28x168xf32> -> vector<28x168xf32>
    %10 = arith.addf %4, %9 : vector<28x168xf32>
    %c0_11 = arith.constant 0 : index
    %c2 = arith.constant 2 : index
    %c0_12 = arith.constant 0 : index
    %11 = vector.load %arg1[%c0_11, %c2, %c0_12] : memref<1x32x33xf32, #tpu.memory_space<vmem>>, vector<1x28x33xf32>
    %12 = vector.shape_cast %11 : vector<1x28x33xf32> to vector<28x33xf32>
    %c2_13 = arith.constant 2 : index
    %c0_14 = arith.constant 0 : index
    %c0_15 = arith.constant 0 : index
    %13 = vector.load %arg2[%c2_13, %c0_14, %c0_15] : memref<5x33x168xf32, #tpu.memory_space<vmem>>, vector<1x33x168xf32>
    %14 = vector.shape_cast %13 : vector<1x33x168xf32> to vector<33x168xf32>
    %cst_16 = arith.constant dense<0.000000e+00> : vector<28x168xf32>
    %15 = tpu.matmul %12, %14, %cst_16 {dimension_numbers = #tpu.dot_dimension_numbers<[1], [0], [0], [1], [0, 0, 1, 1], [], []>} : vector<28x33xf32>, vector<33x168xf32>, vector<28x168xf32> -> vector<28x168xf32>
    %16 = arith.addf %10, %15 : vector<28x168xf32>
    %c0_17 = arith.constant 0 : index
    %c3 = arith.constant 3 : index
    %c0_18 = arith.constant 0 : index
    %17 = vector.load %arg1[%c0_17, %c3, %c0_18] : memref<1x32x33xf32, #tpu.memory_space<vmem>>, vector<1x28x33xf32>
    %18 = vector.shape_cast %17 : vector<1x28x33xf32> to vector<28x33xf32>
    %c3_19 = arith.constant 3 : index
    %c0_20 = arith.constant 0 : index
    %c0_21 = arith.constant 0 : index
    %19 = vector.load %arg2[%c3_19, %c0_20, %c0_21] : memref<5x33x168xf32, #tpu.memory_space<vmem>>, vector<1x33x168xf32>
    %20 = vector.shape_cast %19 : vector<1x33x168xf32> to vector<33x168xf32>
    %cst_22 = arith.constant dense<0.000000e+00> : vector<28x168xf32>
    %21 = tpu.matmul %18, %20, %cst_22 {dimension_numbers = #tpu.dot_dimension_numbers<[1], [0], [0], [1], [0, 0, 1, 1], [], []>} : vector<28x33xf32>, vector<33x168xf32>, vector<28x168xf32> -> vector<28x168xf32>
    %22 = arith.addf %16, %21 : vector<28x168xf32>
    %c0_23 = arith.constant 0 : index
    %c4 = arith.constant 4 : index
    %c0_24 = arith.constant 0 : index
    %23 = vector.load %arg1[%c0_23, %c4, %c0_24] : memref<1x32x33xf32, #tpu.memory_space<vmem>>, vector<1x28x33xf32>
    %24 = vector.shape_cast %23 : vector<1x28x33xf32> to vector<28x33xf32>
    %c4_25 = arith.constant 4 : index
    %c0_26 = arith.constant 0 : index
    %c0_27 = arith.constant 0 : index
    %25 = vector.load %arg2[%c4_25, %c0_26, %c0_27] : memref<5x33x168xf32, #tpu.memory_space<vmem>>, vector<1x33x168xf32>
    %26 = vector.shape_cast %25 : vector<1x33x168xf32> to vector<33x168xf32>
    %cst_28 = arith.constant dense<0.000000e+00> : vector<28x168xf32>
    %27 = tpu.matmul %24, %26, %cst_28 {dimension_numbers = #tpu.dot_dimension_numbers<[1], [0], [0], [1], [0, 0, 1, 1], [], []>} : vector<28x33xf32>, vector<33x168xf32>, vector<28x168xf32> -> vector<28x168xf32>
    %28 = arith.addf %22, %27 : vector<28x168xf32>
    %cst_29 = arith.constant 0.000000e+00 : f32
    %29 = vector.broadcast %cst_29 : f32 to vector<28x168xf32>
    %30 = arith.maximumf %28, %29 : vector<28x168xf32>
    %c0_30 = arith.constant 0 : index
    %c0_31 = arith.constant 0 : index
    %c0_32 = arith.constant 0 : index
    %31 = vector.load %arg3[%c0_30, %c0_31, %c0_32] : memref<2x14x28xf32, #tpu.memory_space<vmem>>, vector<1x14x28xf32>
    %32 = vector.shape_cast %31 : vector<1x14x28xf32> to vector<14x28xf32>
    %cst_33 = arith.constant dense<0.000000e+00> : vector<14x168xf32>
    %33 = tpu.matmul %32, %30, %cst_33 {dimension_numbers = #tpu.dot_dimension_numbers<[1], [0], [0], [1], [0, 0, 1, 1], [], []>} : vector<14x28xf32>, vector<28x168xf32>, vector<14x168xf32> -> vector<14x168xf32>
    %c1_34 = arith.constant 1 : index
    %c0_35 = arith.constant 0 : index
    %c0_36 = arith.constant 0 : index
    %34 = vector.load %arg3[%c1_34, %c0_35, %c0_36] : memref<2x14x28xf32, #tpu.memory_space<vmem>>, vector<1x14x28xf32>
    %35 = vector.shape_cast %34 : vector<1x14x28xf32> to vector<14x28xf32>
    %cst_37 = arith.constant dense<0.000000e+00> : vector<14x168xf32>
    %36 = tpu.matmul %35, %30, %cst_37 {dimension_numbers = #tpu.dot_dimension_numbers<[1], [0], [0], [1], [0, 0, 1, 1], [], []>} : vector<14x28xf32>, vector<28x168xf32>, vector<14x168xf32> -> vector<14x168xf32>
    %37 = arith.maximumf %33, %36 : vector<14x168xf32>
    %c0_38 = arith.constant 0 : index
    %c0_39 = arith.constant 0 : index
    %c0_40 = arith.constant 0 : index
    %38 = vector.load %arg4[%c0_38, %c0_39, %c0_40] : memref<2x168x84xf32, #tpu.memory_space<vmem>>, vector<1x168x84xf32>
    %39 = vector.shape_cast %38 : vector<1x168x84xf32> to vector<168x84xf32>
    %cst_41 = arith.constant dense<0.000000e+00> : vector<14x84xf32>
    %40 = tpu.matmul %37, %39, %cst_41 {dimension_numbers = #tpu.dot_dimension_numbers<[1], [0], [0], [1], [0, 0, 1, 1], [], []>} : vector<14x168xf32>, vector<168x84xf32>, vector<14x84xf32> -> vector<14x84xf32>
    %c1_42 = arith.constant 1 : index
    %c0_43 = arith.constant 0 : index
    %c0_44 = arith.constant 0 : index
    %41 = vector.load %arg4[%c1_42, %c0_43, %c0_44] : memref<2x168x84xf32, #tpu.memory_space<vmem>>, vector<1x168x84xf32>
    %42 = vector.shape_cast %41 : vector<1x168x84xf32> to vector<168x84xf32>
    %cst_45 = arith.constant dense<0.000000e+00> : vector<14x84xf32>
    %43 = tpu.matmul %37, %42, %cst_45 {dimension_numbers = #tpu.dot_dimension_numbers<[1], [0], [0], [1], [0, 0, 1, 1], [], []>} : vector<14x168xf32>, vector<168x84xf32>, vector<14x84xf32> -> vector<14x84xf32>
    %44 = arith.maximumf %40, %43 : vector<14x84xf32>
    %45 = vector.extract_strided_slice %44 {offsets = [0, 0], sizes = [10, 84], strides = [1, 1]} : vector<14x84xf32> to vector<10x84xf32>
    %c0_46 = arith.constant 0 : index
    %c0_47 = arith.constant 0 : index
    %c0_48 = arith.constant 0 : index
    %46 = vector.load %arg5[%c0_46, %c0_47, %c0_48] : memref<5x84x160xf32, #tpu.memory_space<vmem>>, vector<1x84x160xf32>
    %47 = vector.shape_cast %46 : vector<1x84x160xf32> to vector<84x160xf32>
    %cst_49 = arith.constant dense<0.000000e+00> : vector<10x160xf32>
    %48 = tpu.matmul %45, %47, %cst_49 {dimension_numbers = #tpu.dot_dimension_numbers<[1], [0], [0], [1], [0, 0, 1, 1], [], []>} : vector<10x84xf32>, vector<84x160xf32>, vector<10x160xf32> -> vector<10x160xf32>
    %49 = vector.extract_strided_slice %44 {offsets = [1, 0], sizes = [10, 84], strides = [1, 1]} : vector<14x84xf32> to vector<10x84xf32>
    %c1_50 = arith.constant 1 : index
    %c0_51 = arith.constant 0 : index
    %c0_52 = arith.constant 0 : index
    %50 = vector.load %arg5[%c1_50, %c0_51, %c0_52] : memref<5x84x160xf32, #tpu.memory_space<vmem>>, vector<1x84x160xf32>
    %51 = vector.shape_cast %50 : vector<1x84x160xf32> to vector<84x160xf32>
    %cst_53 = arith.constant dense<0.000000e+00> : vector<10x160xf32>
    %52 = tpu.matmul %49, %51, %cst_53 {dimension_numbers = #tpu.dot_dimension_numbers<[1], [0], [0], [1], [0, 0, 1, 1], [], []>} : vector<10x84xf32>, vector<84x160xf32>, vector<10x160xf32> -> vector<10x160xf32>
    %53 = arith.addf %48, %52 : vector<10x160xf32>
    %54 = vector.extract_strided_slice %44 {offsets = [2, 0], sizes = [10, 84], strides = [1, 1]} : vector<14x84xf32> to vector<10x84xf32>
    %c2_54 = arith.constant 2 : index
    %c0_55 = arith.constant 0 : index
    %c0_56 = arith.constant 0 : index
    %55 = vector.load %arg5[%c2_54, %c0_55, %c0_56] : memref<5x84x160xf32, #tpu.memory_space<vmem>>, vector<1x84x160xf32>
    %56 = vector.shape_cast %55 : vector<1x84x160xf32> to vector<84x160xf32>
    %cst_57 = arith.constant dense<0.000000e+00> : vector<10x160xf32>
    %57 = tpu.matmul %54, %56, %cst_57 {dimension_numbers = #tpu.dot_dimension_numbers<[1], [0], [0], [1], [0, 0, 1, 1], [], []>} : vector<10x84xf32>, vector<84x160xf32>, vector<10x160xf32> -> vector<10x160xf32>
    %58 = arith.addf %53, %57 : vector<10x160xf32>
    %59 = vector.extract_strided_slice %44 {offsets = [3, 0], sizes = [10, 84], strides = [1, 1]} : vector<14x84xf32> to vector<10x84xf32>
    %c3_58 = arith.constant 3 : index
    %c0_59 = arith.constant 0 : index
    %c0_60 = arith.constant 0 : index
    %60 = vector.load %arg5[%c3_58, %c0_59, %c0_60] : memref<5x84x160xf32, #tpu.memory_space<vmem>>, vector<1x84x160xf32>
    %61 = vector.shape_cast %60 : vector<1x84x160xf32> to vector<84x160xf32>
    %cst_61 = arith.constant dense<0.000000e+00> : vector<10x160xf32>
    %62 = tpu.matmul %59, %61, %cst_61 {dimension_numbers = #tpu.dot_dimension_numbers<[1], [0], [0], [1], [0, 0, 1, 1], [], []>} : vector<10x84xf32>, vector<84x160xf32>, vector<10x160xf32> -> vector<10x160xf32>
    %63 = arith.addf %58, %62 : vector<10x160xf32>
    %64 = vector.extract_strided_slice %44 {offsets = [4, 0], sizes = [10, 84], strides = [1, 1]} : vector<14x84xf32> to vector<10x84xf32>
    %c4_62 = arith.constant 4 : index
    %c0_63 = arith.constant 0 : index
    %c0_64 = arith.constant 0 : index
    %65 = vector.load %arg5[%c4_62, %c0_63, %c0_64] : memref<5x84x160xf32, #tpu.memory_space<vmem>>, vector<1x84x160xf32>
    %66 = vector.shape_cast %65 : vector<1x84x160xf32> to vector<84x160xf32>
    %cst_65 = arith.constant dense<0.000000e+00> : vector<10x160xf32>
    %67 = tpu.matmul %64, %66, %cst_65 {dimension_numbers = #tpu.dot_dimension_numbers<[1], [0], [0], [1], [0, 0, 1, 1], [], []>} : vector<10x84xf32>, vector<84x160xf32>, vector<10x160xf32> -> vector<10x160xf32>
    %68 = arith.addf %63, %67 : vector<10x160xf32>
    %c0_66 = arith.constant 0 : index
    %c0_67 = arith.constant 0 : index
    %69 = vector.load %arg6[%c0_66, %c0_67] : memref<1x160xf32, #tpu.memory_space<vmem>>, vector<1x160xf32>
    %70 = vector.broadcast %69 : vector<1x160xf32> to vector<10x160xf32>
    %71 = arith.addf %68, %70 : vector<10x160xf32>
    %cst_68 = arith.constant 0.000000e+00 : f32
    %72 = vector.broadcast %cst_68 : f32 to vector<10x160xf32>
    %73 = arith.maximumf %71, %72 : vector<10x160xf32>
    %c0_69 = arith.constant 0 : index
    %c0_70 = arith.constant 0 : index
    %c0_71 = arith.constant 0 : index
    %74 = vector.load %arg7[%c0_69, %c0_70, %c0_71] : memref<2x5x10xf32, #tpu.memory_space<vmem>>, vector<1x5x10xf32>
    %75 = vector.shape_cast %74 : vector<1x5x10xf32> to vector<5x10xf32>
    %cst_72 = arith.constant dense<0.000000e+00> : vector<5x160xf32>
    %76 = tpu.matmul %75, %73, %cst_72 {dimension_numbers = #tpu.dot_dimension_numbers<[1], [0], [0], [1], [0, 0, 1, 1], [], []>} : vector<5x10xf32>, vector<10x160xf32>, vector<5x160xf32> -> vector<5x160xf32>
    %c1_73 = arith.constant 1 : index
    %c0_74 = arith.constant 0 : index
    %c0_75 = arith.constant 0 : index
    %77 = vector.load %arg7[%c1_73, %c0_74, %c0_75] : memref<2x5x10xf32, #tpu.memory_space<vmem>>, vector<1x5x10xf32>
    %78 = vector.shape_cast %77 : vector<1x5x10xf32> to vector<5x10xf32>
    %cst_76 = arith.constant dense<0.000000e+00> : vector<5x160xf32>
    %79 = tpu.matmul %78, %73, %cst_76 {dimension_numbers = #tpu.dot_dimension_numbers<[1], [0], [0], [1], [0, 0, 1, 1], [], []>} : vector<5x10xf32>, vector<10x160xf32>, vector<5x160xf32> -> vector<5x160xf32>
    %80 = arith.maximumf %76, %79 : vector<5x160xf32>
    %c0_77 = arith.constant 0 : index
    %c0_78 = arith.constant 0 : index
    %c0_79 = arith.constant 0 : index
    %81 = vector.load %arg8[%c0_77, %c0_78, %c0_79] : memref<2x160x80xf32, #tpu.memory_space<vmem>>, vector<1x160x80xf32>
    %82 = vector.shape_cast %81 : vector<1x160x80xf32> to vector<160x80xf32>
    %cst_80 = arith.constant dense<0.000000e+00> : vector<5x80xf32>
    %83 = tpu.matmul %80, %82, %cst_80 {dimension_numbers = #tpu.dot_dimension_numbers<[1], [0], [0], [1], [0, 0, 1, 1], [], []>} : vector<5x160xf32>, vector<160x80xf32>, vector<5x80xf32> -> vector<5x80xf32>
    %c1_81 = arith.constant 1 : index
    %c0_82 = arith.constant 0 : index
    %c0_83 = arith.constant 0 : index
    %84 = vector.load %arg8[%c1_81, %c0_82, %c0_83] : memref<2x160x80xf32, #tpu.memory_space<vmem>>, vector<1x160x80xf32>
    %85 = vector.shape_cast %84 : vector<1x160x80xf32> to vector<160x80xf32>
    %cst_84 = arith.constant dense<0.000000e+00> : vector<5x80xf32>
    %86 = tpu.matmul %80, %85, %cst_84 {dimension_numbers = #tpu.dot_dimension_numbers<[1], [0], [0], [1], [0, 0, 1, 1], [], []>} : vector<5x160xf32>, vector<160x80xf32>, vector<5x80xf32> -> vector<5x80xf32>
    %87 = arith.maximumf %83, %86 : vector<5x80xf32>
    %cst_85 = arith.constant dense<0.000000e+00> : vector<80xf32>
    %88 = vector.multi_reduction <add>, %87, %cst_85 [0] : vector<5x80xf32> to vector<80xf32>
    %89 = vector.shape_cast %88 : vector<80xf32> to vector<1x80xf32>
    %c0_86 = arith.constant 0 : index
    %c0_87 = arith.constant 0 : index
    %90 = vector.load %arg9[%c0_86, %c0_87] : memref<80x128xf32, #tpu.memory_space<vmem>>, vector<80x128xf32>
    %cst_88 = arith.constant dense<0.000000e+00> : vector<1x128xf32>
    %91 = tpu.matmul %89, %90, %cst_88 {dimension_numbers = #tpu.dot_dimension_numbers<[1], [0], [0], [1], [0, 0, 1, 1], [], []>} : vector<1x80xf32>, vector<80x128xf32>, vector<1x128xf32> -> vector<1x128xf32>
    %c0_89 = arith.constant 0 : index
    %c0_90 = arith.constant 0 : index
    %92 = vector.load %arg10[%c0_89, %c0_90] : memref<1x128xf32, #tpu.memory_space<vmem>>, vector<1x128xf32>
    %93 = arith.addf %91, %92 : vector<1x128xf32>
    %cst_91 = arith.constant 0.000000e+00 : f32
    %94 = vector.broadcast %cst_91 : f32 to vector<1x128xf32>
    %95 = arith.maximumf %93, %94 : vector<1x128xf32>
    %c0_92 = arith.constant 0 : index
    %c0_93 = arith.constant 0 : index
    %96 = vector.load %arg11[%c0_92, %c0_93] : memref<128x128xf32, #tpu.memory_space<vmem>>, vector<128x128xf32>
    %cst_94 = arith.constant dense<0.000000e+00> : vector<1x128xf32>
    %97 = tpu.matmul %95, %96, %cst_94 {dimension_numbers = #tpu.dot_dimension_numbers<[1], [0], [0], [1], [0, 0, 1, 1], [], []>} : vector<1x128xf32>, vector<128x128xf32>, vector<1x128xf32> -> vector<1x128xf32>
    %c0_95 = arith.constant 0 : index
    %c0_96 = arith.constant 0 : index
    %98 = vector.load %arg12[%c0_95, %c0_96] : memref<1x128xf32, #tpu.memory_space<vmem>>, vector<1x128xf32>
    %99 = arith.addf %97, %98 : vector<1x128xf32>
    %cst_97 = arith.constant 0.000000e+00 : f32
    %100 = vector.broadcast %cst_97 : f32 to vector<1x128xf32>
    %101 = arith.maximumf %99, %100 : vector<1x128xf32>
    %c0_98 = arith.constant 0 : index
    %c0_99 = arith.constant 0 : index
    %102 = vector.load %arg13[%c0_98, %c0_99] : memref<128x128xf32, #tpu.memory_space<vmem>>, vector<128x128xf32>
    %cst_100 = arith.constant dense<0.000000e+00> : vector<1x128xf32>
    %103 = tpu.matmul %101, %102, %cst_100 {dimension_numbers = #tpu.dot_dimension_numbers<[1], [0], [0], [1], [0, 0, 1, 1], [], []>} : vector<1x128xf32>, vector<128x128xf32>, vector<1x128xf32> -> vector<1x128xf32>
    %c0_101 = arith.constant 0 : index
    %c0_102 = arith.constant 0 : index
    %104 = vector.load %arg14[%c0_101, %c0_102] : memref<1x128xf32, #tpu.memory_space<vmem>>, vector<1x128xf32>
    %105 = arith.addf %103, %104 : vector<1x128xf32>
    %106 = vector.extract_strided_slice %105 {offsets = [0, 0], sizes = [1, 10], strides = [1, 1]} : vector<1x128xf32> to vector<1x10xf32>
    %c0_103 = arith.constant 0 : index
    %c0_104 = arith.constant 0 : index
    %c0_105 = arith.constant 0 : index
    %107 = vector.load %arg15[%c0_103, %c0_104, %c0_105] : memref<1x1x10xf32, #tpu.memory_space<vmem>>, vector<1x1x10xf32>
    %108 = vector.shape_cast %107 : vector<1x1x10xf32> to vector<1x10xf32>
    %109 = vector.shape_cast %106 : vector<1x10xf32> to vector<1x1x10xf32>
    tpu.vector_store %arg15[%c0_103, %c0_104, %c0_105], %109 {strides = array<i32>} : memref<1x1x10xf32, #tpu.memory_space<vmem>>, vector<1x1x10xf32>,
    return
  }
  func.func @transform_0(%arg0: i32) -> (i32, i32, i32) {
    %c0_i32 = arith.constant 0 : i32
    %c0_i32_0 = arith.constant 0 : i32
    %c0_i32_1 = arith.constant 0 : i32
    return %arg0, %c0_i32, %c0_i32_0 : i32, i32, i32
  }
  func.func @transform_1(%arg0: i32) -> (i32, i32, i32) {
    %c0_i32 = arith.constant 0 : i32
    %c0_i32_0 = arith.constant 0 : i32
    %c0_i32_1 = arith.constant 0 : i32
    %c0_i32_2 = arith.constant 0 : i32
    return %c0_i32, %c0_i32_0, %c0_i32_1 : i32, i32, i32
  }
  func.func @transform_2(%arg0: i32) -> (i32, i32, i32) {
    %c0_i32 = arith.constant 0 : i32
    %c0_i32_0 = arith.constant 0 : i32
    %c0_i32_1 = arith.constant 0 : i32
    %c0_i32_2 = arith.constant 0 : i32
    return %c0_i32, %c0_i32_0, %c0_i32_1 : i32, i32, i32
  }
  func.func @transform_3(%arg0: i32) -> (i32, i32, i32) {
    %c0_i32 = arith.constant 0 : i32
    %c0_i32_0 = arith.constant 0 : i32
    %c0_i32_1 = arith.constant 0 : i32
    %c0_i32_2 = arith.constant 0 : i32
    return %c0_i32, %c0_i32_0, %c0_i32_1 : i32, i32, i32
  }
  func.func @transform_4(%arg0: i32) -> (i32, i32, i32) {
    %c0_i32 = arith.constant 0 : i32
    %c0_i32_0 = arith.constant 0 : i32
    %c0_i32_1 = arith.constant 0 : i32
    %c0_i32_2 = arith.constant 0 : i32
    return %c0_i32, %c0_i32_0, %c0_i32_1 : i32, i32, i32
  }
  func.func @transform_5(%arg0: i32) -> (i32, i32) {
    %c0_i32 = arith.constant 0 : i32
    %c0_i32_0 = arith.constant 0 : i32
    %c0_i32_1 = arith.constant 0 : i32
    return %c0_i32, %c0_i32_0 : i32, i32
  }
  func.func @transform_6(%arg0: i32) -> (i32, i32, i32) {
    %c0_i32 = arith.constant 0 : i32
    %c0_i32_0 = arith.constant 0 : i32
    %c0_i32_1 = arith.constant 0 : i32
    %c0_i32_2 = arith.constant 0 : i32
    return %c0_i32, %c0_i32_0, %c0_i32_1 : i32, i32, i32
  }
  func.func @transform_7(%arg0: i32) -> (i32, i32, i32) {
    %c0_i32 = arith.constant 0 : i32
    %c0_i32_0 = arith.constant 0 : i32
    %c0_i32_1 = arith.constant 0 : i32
    %c0_i32_2 = arith.constant 0 : i32
    return %c0_i32, %c0_i32_0, %c0_i32_1 : i32, i32, i32
  }
  func.func @transform_8(%arg0: i32) -> (i32, i32) {
    %c0_i32 = arith.constant 0 : i32
    %c0_i32_0 = arith.constant 0 : i32
    %c0_i32_1 = arith.constant 0 : i32
    return %c0_i32, %c0_i32_0 : i32, i32
  }
  func.func @transform_9(%arg0: i32) -> (i32, i32) {
    %c0_i32 = arith.constant 0 : i32
    %c0_i32_0 = arith.constant 0 : i32
    %c0_i32_1 = arith.constant 0 : i32
    return %c0_i32, %c0_i32_0 : i32, i32
  }
  func.func @transform_10(%arg0: i32) -> (i32, i32) {
    %c0_i32 = arith.constant 0 : i32
    %c0_i32_0 = arith.constant 0 : i32
    %c0_i32_1 = arith.constant 0 : i32
    return %c0_i32, %c0_i32_0 : i32, i32
  }
  func.func @transform_11(%arg0: i32) -> (i32, i32) {
    %c0_i32 = arith.constant 0 : i32
    %c0_i32_0 = arith.constant 0 : i32
    %c0_i32_1 = arith.constant 0 : i32
    return %c0_i32, %c0_i32_0 : i32, i32
  }
  func.func @transform_12(%arg0: i32) -> (i32, i32) {
    %c0_i32 = arith.constant 0 : i32
    %c0_i32_0 = arith.constant 0 : i32
    %c0_i32_1 = arith.constant 0 : i32
    return %c0_i32, %c0_i32_0 : i32, i32
  }
  func.func @transform_13(%arg0: i32) -> (i32, i32) {
    %c0_i32 = arith.constant 0 : i32
    %c0_i32_0 = arith.constant 0 : i32
    %c0_i32_1 = arith.constant 0 : i32
    return %c0_i32, %c0_i32_0 : i32, i32
  }
  func.func @transform_14(%arg0: i32) -> (i32, i32, i32) {
    %c0_i32 = arith.constant 0 : i32
    %c0_i32_0 = arith.constant 0 : i32
    %c0_i32_1 = arith.constant 0 : i32
    return %arg0, %c0_i32, %c0_i32_0 : i32, i32, i32
  }
}

</mosaic_0001>

<bundles_post_ra>
// kernel: lenet5_forward.1
= control target key start
LH: loop header
LB: loop body
LE: loop exit
PB: predicated region body
PF: predicated region fallthrough
CT: control target
= control target key end

     0   :  { %s3702_s0 = inlined_call_operand.vmem [shape: f32[2,32,33], index: 0, kind: input, shape index: {}]   ;;  %s3703_s1 = inlined_call_operand.vmem [shape: f32[5,33,168], index: 1, kind: input, shape index: {}]   ;;  %s3704_s2 = inlined_call_operand.vmem [shape: f32[2,14,28], index: 2, kind: input, shape index: {}]   ;;  %s3705_s3 = inlined_call_operand.vmem [shape: f32[2,168,84], index: 3, kind: input, shape index: {}]   ;;  %s3706_s4 = inlined_call_operand.vmem [shape: f32[5,84,160], index: 4, kind: input, shape index: {}]   ;;  %s3707_s5 = inlined_call_operand.vmem [shape: f32[1,160], index: 5, kind: input, shape index: {}]   ;;  %s3708_s6 = inlined_call_operand.vmem [shape: f32[2,5,10], index: 6, kind: input, shape index: {}]   ;;  %s3709_s7 = inlined_call_operand.vmem [shape: f32[2,160,80], index: 7, kind: input, shape index: {}]   ;;  %s3710_s8 = inlined_call_operand.vmem [shape: f32[80,128], index: 8, kind: input, shape index: {}]   ;;  %s3711_s9 = inlined_call_operand.vmem [shape: f32[1,128], index: 9, kind: input, shape index: {}]   ;;  %s3712_s10 = inlined_call_operand.vmem [shape: f32[128,128], index: 10, kind: input, shape index: {}]   ;;  %s3713_s11 = inlined_call_operand.vmem [shape: f32[1,128], index: 11, kind: input, shape index: {}]   ;;  %s3714_s12 = inlined_call_operand.vmem [shape: f32[128,128], index: 12, kind: input, shape index: {}]   ;;  %s3715_s13 = inlined_call_operand.vmem [shape: f32[1,128], index: 13, kind: input, shape index: {}]   ;;  %s3716_s14 = inlined_call_operand.hbm [shape: f32[2,1,10], index: 14, kind: output, shape index: {}]  }
   0x1   :  { %3721 = sst [smem:[#allocation9_spill]] %s3702_s0 }
   0x2   :  { %19 = vsyncpa [#allocation3], 0 }
   0x3   :  { %21 = vsyncpa [#allocation3 + $0x1], 0  ;;  %s2545_s29 = smov 0   ;;  %s2547_s30 = smov 0  }
   0x4   :  { %s2549_s15 = smov 0   ;;  %s2551_s16 = smov 0  }
   0x5 LB: > { %3722 = sst [smem:[#allocation5_spill]] %s2464_s15  ;;  %s2566_s17 = sadd.s32 4294967295, %s2468_s16   ;;  %s2468_s16 = sphi %s2551_s16, %s3730_s16   ;;  %s2464_s15 = sphi %s2549_s15, %s3732_s15   ;;  %s2460_s30 = sphi %s2547_s30, %s3734_s30   ;;  %s2456_s29 = sphi %s2545_s29, %s3733_s29  }
   0x6   : > { %s2070_s18 = sadd.s32 4294967294, %s2468_s16   ;;  %s2570_s19 = sadd.s32 1, %s2468_s16  }
   0x7   : > { %3723 = sst [smem:[#allocation6_spill]] %s2570_s19  ;;  %s333_s20 = sadd.s32 1, %s2464_s15 }
   0x8   : > { %s330_s21 = ssub.s32 %s2468_s16, %s2570_s19  ;;  %p343_p0 = scmp.ne.s32.totalorder %s2464_s15, %s2460_s30 }
   0x9   : > { %p331_p1 = scmp.eq.s32.totalorder %s330_s21, 0  ;;  %p344_p2 = scmp.eq.s32.totalorder %s2566_s17, 1 }
   0xa   : > { %p349_p3 = scmp.ne.s32.totalorder %s2460_s30, %s2456_s29  ;;  %p350_p4 = scmp.eq.s32.totalorder %s2070_s18, 1 }
   0xb   : > { %s2581_s22 = scalar_select %p331_p1, %s2464_s15, %s333_s20  }
   0xc   : > { %p2583_p5 = por %p344_p2, %p343_p0  ;;  %p2587_p6 = por %p350_p4, %p349_p3 }
   0xd   : > { %3724 = sst [smem:[#allocation7_spill]] %s2581_s22  ;;  %p2073_p7 = scmp.ge.s32.totalorder %s2468_s16, 1 }
   0xe   : > { %s3726_s24 = scalar_select %p2587_p6, 1, 0 }
   0xf   : > { %p415_p8 = scmp.lt.s32.totalorder %s2468_s16, 3 }
  0x10   : > { %3727 = sst [smem:[#allocation8_spill]] %s3726_s24 }
  0x11   : > { %p416_p9 = pnand %p2073_p7, %p415_p8 }
  0x12   : > { %p460_p10 = scmp.lt.s32.totalorder (!%p416_p9), %s2566_s17, 1  ;;  %s3728_s0 = sld [smem:[#allocation9_spill]] (!%p416_p9) }
  0x13   : > { %419 = sbr.rel (%p416_p9) target bundleno = 1452 (0x5ac), region = 76  ;;  %s458_s22 = sand.u32 (!%p416_p9), 1, %s2460_s30  }
  0x14   : > { %s2426_s24 = scalar_lea.hbm (!%p416_p9), %s3716_s14, 2 }
  0x18   : > { %v2084_v0 = vld [vmem:[%s3703_s1 + $0x90] sm:$0x1]  ;;  %vm507_vm0 = vcmask 1040384   ;;  %v477_v1 = vld [vmem:[%s3703_s1 + $0x40] sm:$0x1]  ;;  %s461_s18 = scalar_select %p460_p10, %s2566_s17, 1 }
  0x19   : > { %v2082_v2 = vld [vmem:[%s3703_s1 + $0x80] sm:$0xff]  ;;  %2086 = vmatpush.msk.msra.mxu0 %vm507_vm0, %v2084_v0  ;;  %2358 = vmatpush.msk.msra.mxu1 %vm507_vm0, %v2084_v0  ;;  %v475_v3 = vld [vmem:[%s3703_s1 + $0x30] sm:$0xff]  ;;  %v478_v6 = vld [vmem:[%s3703_s1 + $0x48] sm:$0x1]  ;;  %vm494_vm1 = vcmask 269312   ;;  %vm962_vm2 = vcmask 1043456  }
  0x1a   : > { %2096 = vmatpush.msk.msra.mxu2 %vm507_vm0, %v477_v1  ;;  %v2080_v4 = vld [vmem:[%s3703_s1 + $0x70] sm:$0xff]  ;;  %v473_v5 = vld [vmem:[%s3703_s1 + $0x20] sm:$0xff]  ;;  %v476_v7 = vld [vmem:[%s3703_s1 + $0x38] sm:$0xff]  ;;  %2101 = vmatpush.msk.msra.mxu3 %vm507_vm0, %v478_v6  ;;  %s2357_s27 = sshll.u32 %s461_s18, 5  ;;  %vm955_vm3 = vcmask 228352   ;;  %vm1095_vm4 = vcmask 326656   ;;  %s2011_s18 = scalar_lea.hbm %s3716_s14, %s2566_s17 }
  0x1b   : > { %526 = vmatpush.msra.mxu0 %v2082_v2  ;;  %2359 = vmatpush.msra.mxu1 %v2082_v2  ;;  %v2078_v8 = vld [vmem:[%s3703_s1 + $0x60] sm:$0xff]  ;;  %v471_v9 = vld [vmem:[%s3703_s1 + $0x10] sm:$0xff]  ;;  %v474_v10 = vld [vmem:[%s3703_s1 + $0x28] sm:$0xff]  ;;  %s2638_s21 = scalar_lea.vmem %s3728_s0, %s2357_s27  ;;  %vm1269_vm5 = vcmask 687104   ;;  %vm1265_vm6 = vcmask 1046528   ;;  %vm1492_vm7 = vcmask 1044480  }
  0x1c   : > { %602 = vmatpush.msra.mxu2 %v475_v3  ;;  %v2076_v11 = vld [vmem:[%s3703_s1 + $0x50] sm:$0xff]  ;;  %631 = vmatpush.msra.mxu3 %v476_v7  ;;  %v469_v12 = vld [vmem:[%s3703_s1] sm:$0xff]  ;;  %v2085_v16 = vld [vmem:[%s3703_s1 + $0x98] sm:$0x1]  ;;  %vm1405_vm8 = vcmask 1045504   ;;  %vm1661_vm9 = vcmask 1041408  }
  0x1d   : > { %527 = vmatpush.msra.mxu0 %v2080_v4  ;;  %2360 = vmatpush.msra.mxu1 %v2080_v4  ;;  %v2644_v13 = vld [vmem:[%s2638_s21 + $0x1] sm:$0xff]  ;;  %v2647_v14 = vld [vmem:[%s2638_s21 + $0x11] sm:$0xff]  ;;  %v2114_v18 = vld [vmem:[%s3703_s1 + $0xe0] sm:$0x1]  ;;  %vm1657_vm10 = vcmask 80896   ;;  %vm1775_vm11 = vcmask 261120  }
  0x1e   : > { %603 = vmatpush.msra.mxu2 %v473_v5  ;;  %v465_v15 = vld [vmem:[%s2638_s21] sm:$0xff]  ;;  %632 = vmatpush.msra.mxu3 %v474_v10  ;;  %v472_v17 = vld [vmem:[%s3703_s1 + $0x18] sm:$0xff]  ;;  %v2083_v19 = vld [vmem:[%s3703_s1 + $0x88] sm:$0xff]  ;;  %vm1881_vm12 = vcmask 651264   ;;  %vm1900_vm13 = vcmask 654336   ;;  %s459_s27 = scalar_lea.vmem [#allocation2], %s458_s22 }
  0x1f   : > { %528 = vmatpush.msra.mxu0 %v2078_v8  ;;  %2361 = vmatpush.msra.mxu1 %v2078_v8  ;;  %v470_v20 = vld [vmem:[%s3703_s1 + $0x8] sm:$0xff]  ;;  %v2134_v21 = vld [vmem:[%s3703_s1 + $0x130] sm:$0x1]  ;;  %v2081_v23 = vld [vmem:[%s3703_s1 + $0x78] sm:$0xff]  ;;  %s2013_s15 = sshll.u32 %s459_s27, 4  ;;  %s2015_s28 = sshll.u32 %s2011_s18, 4  ;;  %s2014_s15 = int_to_ptr.vmem [resolvable:$true] %s2013_s15  ;;  %s2016_s28 = int_to_ptr.hbm [resolvable:$true] %s2015_s28 }
  0x20   : > { %604 = vmatpush.msra.mxu2 %v471_v9  ;;  %633 = vmatpush.msra.mxu3 %v472_v17  ;;  %v2112_v22 = vld [vmem:[%s3703_s1 + $0xd0] sm:$0xff]  ;;  %v2132_v24 = vld [vmem:[%s3703_s1 + $0x120] sm:$0xff]  ;;  %v2135_v26 = vld [vmem:[%s3703_s1 + $0x138] sm:$0x1]  ;;  %vm2000_vm14 = vcmask 73728   ;;  %s2420_s20 = sshra.s32 %s2016_s28, 4  ;;  %s2421_s20 = int_to_ptr.hbm [resolvable:$true] %s2420_s20 }
  0x21   : > { %529 = vmatpush.msra.mxu0 %v2076_v11  ;;  %2362 = vmatpush.msra.mxu1 %v2076_v11  ;;  %v2110_v25 = vld [vmem:[%s3703_s1 + $0xc0] sm:$0xff]  ;;  %v2692_v27 = vld [vmem:[%s2638_s21 + $0x9] sm:$0xff]  ;;  %v2699_v29 = vld [vmem:[%s2638_s21 + $0x19] sm:$0xf]  ;;  %s2422_s0 = scalar_lea.hbm %s2421_s20, 1  ;;  %p2427_p0 = scmp.lt.s32.totalorder %s2421_s20, %s3716_s14 }
  0x22   : > { %605 = vmatpush.msra.mxu2 %v469_v12  ;;  %2087 = vmatmul.msk.f32.vlgmr.msra.gmra.mxu0 %vm494_vm1, %v2644_v13  ;;  %v2079_v28 = vld [vmem:[%s3703_s1 + $0x68] sm:$0xff]  ;;  %v2108_v31 = vld [vmem:[%s3703_s1 + $0xb0] sm:$0xff]  ;;  %v2077_v32 = vld [vmem:[%s3703_s1 + $0x58] sm:$0xff]  ;;  %p2423_p11 = scmp.ne.s32.totalorder %s2421_s20, %s2422_s0  ;;  %p2428_p1 = scmp.lt.s32.totalorder %s2426_s24, %s2422_s0 }
  0x23   : > { %2089 = vmatmul.msk.f32.vlgmr.msra.gmra.mxu1 %vm494_vm1, %v2647_v14  ;;  %2097 = vmatmul.msk.f32.vlgmr.msra.gmra.mxu2 %vm494_vm1, %v465_v15  ;;  %v466_v30 = vld [vmem:[%s2638_s21 + $0x8] sm:$0xff]  ;;  %v2130_v33 = vld [vmem:[%s3703_s1 + $0x110] sm:$0xff]  ;;  %v2106_v35 = vld [vmem:[%s3703_s1 + $0xa0] sm:$0xff] }
  0x24   : > { %2091 = vmatpush.msk.msrb.mxu1 %vm507_vm0, %v2085_v16  ;;  %2116 = vmatpush.msk.msrb.mxu0 %vm507_vm0, %v2114_v18  ;;  %v2133_v34 = vld [vmem:[%s3703_s1 + $0x128] sm:$0xff]  ;;  %v2128_v37 = vld [vmem:[%s3703_s1 + $0x100] sm:$0xff]  ;;  %v2131_v38 = vld [vmem:[%s3703_s1 + $0x118] sm:$0xff]  ;;  %p2424_p12 = pnand %p2423_p11, %p2583_p5  ;;  %p2429_p2 = por %p2428_p1, %p2427_p0 }
  0x25   : > { %2136 = vmatpush.msk.msrb.mxu2 %vm507_vm0, %v2134_v21  ;;  %634 = vmatpush.msra.mxu3 %v470_v20  ;;  %v2115_v36 = vld [vmem:[%s3703_s1 + $0xe8] sm:$0x1]  ;;  %v2154_v39 = vld [vmem:[%s3703_s1 + $0x180] sm:$0x1]  ;;  %v2126_v40 = vld [vmem:[%s3703_s1 + $0xf0] sm:$0xff] }
  0x26   : > { %555 = vmatpush.msrb.mxu1 %v2083_v19  ;;  %693 = vmatpush.msrb.mxu0 %v2112_v22  ;;  %v2113_v41 = vld [vmem:[%s3703_s1 + $0xd8] sm:$0xff]  ;;  %v648_v42 = vld [vmem:[%s2638_s21 + $0x2] sm:$0xff]  ;;  %v467_v44 = vld [vmem:[%s2638_s21 + $0x10] sm:$0xff]  ;;  %p2425_p13 = pneg %p2424_p12 }
  0x27   : > { %2102 = vmatmul.msk.f32.vlgmr.msra.gmra.mxu3 %vm494_vm1, %v465_v15  ;;  %792 = vmatpush.msrb.mxu2 %v2132_v24  ;;  %v2129_v43 = vld [vmem:[%s3703_s1 + $0x108] sm:$0xff]  ;;  %v2152_v45 = vld [vmem:[%s3703_s1 + $0x170] sm:$0xff]  ;;  %v2127_v47 = vld [vmem:[%s3703_s1 + $0xf8] sm:$0xff] }
  0x28   : > { %556 = vmatpush.msrb.mxu1 %v2081_v23  ;;  %694 = vmatpush.msrb.mxu0 %v2110_v25  ;;  %v2111_v46 = vld [vmem:[%s3703_s1 + $0xc8] sm:$0xff]  ;;  %v2150_v48 = vld [vmem:[%s3703_s1 + $0x160] sm:$0xff]  ;;  %v2109_v49 = vld [vmem:[%s3703_s1 + $0xb8] sm:$0xff]  ;;  %p2430_p3 = pnand %p2429_p2, %p2425_p13 }
  0x29   : > { %2141 = vmatpush.msk.msrb.mxu3 %vm507_vm0, %v2135_v26  ;;  %793 = vmatpush.msrb.mxu2 %v2130_v33  ;;  %v2148_v50 = vld [vmem:[%s3703_s1 + $0x150] sm:$0xff]  ;;  %v2107_v51 = vld [vmem:[%s3703_s1 + $0xa8] sm:$0xff]  ;;  %v468_v53 = vld [vmem:[%s2638_s21 + $0x18] sm:$0xf] }
  0x2a   : > { %2088 = vmatmul.msk.f32.gmra.mxu0 %vm494_vm1, %v2692_v27  ;;  %557 = vmatpush.msrb.mxu1 %v2079_v28  ;;  %v649_v52 = vld [vmem:[%s2638_s21 + $0xa] sm:$0xff]  ;;  %v2146_v54 = vld [vmem:[%s3703_s1 + $0x140] sm:$0xff]  ;;  %v650_v55 = vld [vmem:[%s2638_s21 + $0x12] sm:$0xff] }
  0x2b   : > { %2090 = vmatmul.msk.f32.gmra.mxu1 %vm494_vm1, %v2699_v29  ;;  %2098 = vmatmul.msk.f32.gmra.mxu2 %vm494_vm1, %v466_v30  ;;  %v747_v56 = vld [vmem:[%s2638_s21 + $0x3] sm:$0xff]  ;;  %v651_v58 = vld [vmem:[%s2638_s21 + $0x1a] sm:$0xf]  ;;  %v748_v59 = vld [vmem:[%s2638_s21 + $0xb] sm:$0xff] }
  0x2c   : > { %695 = vmatpush.msrb.mxu0 %v2108_v31  ;;  %558 = vmatpush.msrb.mxu1 %v2077_v32  ;;  %v2155_v57 = vld [vmem:[%s3703_s1 + $0x188] sm:$0x1]  ;;  %v2153_v60 = vld [vmem:[%s3703_s1 + $0x178] sm:$0xff]  ;;  %v847_v2 = vld [vmem:[%s2638_s21 + $0xc] sm:$0xff] }
  0x2d   : > { %821 = vmatpush.msrb.mxu3 %v2133_v34  ;;  %794 = vmatpush.msrb.mxu2 %v2128_v37  ;;  %v2151_v61 = vld [vmem:[%s3703_s1 + $0x168] sm:$0xff]  ;;  %v2149_v62 = vld [vmem:[%s3703_s1 + $0x158] sm:$0xff] }
  0x2e   : > { %696 = vmatpush.msrb.mxu0 %v2106_v35  ;;  %2121 = vmatpush.msk.msra.mxu1 %vm507_vm0, %v2115_v36  ;;  %v846_v63 = vld [vmem:[%s2638_s21 + $0x4] sm:$0xff]  ;;  %v749_v1 = vld [vmem:[%s2638_s21 + $0x13] sm:$0xff]  ;;  %v750_v3 = vld [vmem:[%s2638_s21 + $0x1b] sm:$0xf] }
  0x2f   : > { %2103 = vmatmul.msk.f32.gmra.mxu3 %vm494_vm1, %v466_v30  ;;  %795 = vmatpush.msrb.mxu2 %v2126_v40  ;;  %v2147_v0 = vld [vmem:[%s3703_s1 + $0x148] sm:$0xff]  ;;  %v848_v4 = vld [vmem:[%s2638_s21 + $0x14] sm:$0xff]  ;;  %v849_v5 = vld [vmem:[%s2638_s21 + $0x1c] sm:$0xf]  ;;  %s2003_s21 = scalar_lea.sflag [#allocation3], %s458_s22 }
  0x30   : > { %822 = vmatpush.msrb.mxu3 %v2131_v38  ;;  %2156 = vmatpush.msk.msra.mxu0 %vm507_vm0, %v2154_v39 }
  0x31   : > { %722 = vmatpush.msra.mxu1 %v2113_v41 }
  0x32   : > { %2117 = vmatmul.msk.f32.vlgmr.msrb.gmra.mxu0 %vm494_vm1, %v648_v42  ;;  %823 = vmatpush.msrb.mxu3 %v2129_v43 }
  0x33   : > { %2092 = vmatmul.msk.f32.vlgmr.msrb.gmra.mxu1 %vm494_vm1, %v2644_v13  ;;  %2099 = vmatmul.msk.f32.gmra.mxu2 %vm494_vm1, %v467_v44 }
  0x34   : > { %891 = vmatpush.msra.mxu0 %v2152_v45  ;;  %723 = vmatpush.msra.mxu1 %v2111_v46 }
  0x35   : > { %824 = vmatpush.msrb.mxu3 %v2127_v47 }
  0x36   : > { %892 = vmatpush.msra.mxu0 %v2150_v48  ;;  %724 = vmatpush.msra.mxu1 %v2109_v49 }
  0x37   : > { %2104 = vmatmul.msk.f32.gmra.mxu3 %vm494_vm1, %v467_v44 }
  0x38   : > { %893 = vmatpush.msra.mxu0 %v2148_v50  ;;  %725 = vmatpush.msra.mxu1 %v2107_v51 }
  0x3a   : > { %2118 = vmatmul.msk.f32.gmra.mxu0 %vm494_vm1, %v649_v52  ;;  %2161 = vmatpush.msk.msrb.mxu1 %vm507_vm0, %v2155_v57 }
  0x3b   : > { %2093 = vmatmul.msk.f32.gmra.mxu1 %vm494_vm1, %v2692_v27  ;;  %2100 = vmatmul.msk.f32.gmra.mxu2 %vm494_vm1, %v468_v53 }
  0x3c   : > { %894 = vmatpush.msra.mxu0 %v2146_v54  ;;  %920 = vmatpush.msrb.mxu1 %v2153_v60 }
  0x3e   : > { %921 = vmatpush.msrb.mxu1 %v2151_v61  ;;  %v2856_v61 = vld [vmem:[%s3704_s2 + $0x8] sm:$0x3f] }
  0x3f   : > { %2105 = vmatmul.msk.f32.gmra.mxu3 %vm494_vm1, %v468_v53 }
  0x40   : > { %922 = vmatpush.msrb.mxu1 %v2149_v62  ;;  %v953_v62 = vld [vmem:[%s3704_s2] sm:$0xff] }
  0x42   : > { %2119 = vmatmul.msk.f32.gmra.mxu0 %vm494_vm1, %v650_v55  ;;  %923 = vmatpush.msrb.mxu1 %v2147_v0  ;;  %v2868_v0 = vld [vmem:[%s3704_s2 + $0x10] sm:$0xff] }
  0x43   : > { %2094 = vmatmul.msk.f32.gmra.mxu1 %vm494_vm1, %v2647_v14  ;;  %2137 = vmatmul.msk.f32.vlgmr.msrb.gmra.mxu2 %vm494_vm1, %v747_v56 }
  0x47   : > { %2142 = vmatmul.msk.f32.vlgmr.msrb.gmra.mxu3 %vm494_vm1, %v747_v56 }
  0x4a   : > { %2120 = vmatmul.msk.f32.gmra.mxu0 %vm494_vm1, %v651_v58 }
  0x4b   : > { %2095 = vmatmul.msk.f32.gmra.mxu1 %vm494_vm1, %v2699_v29  ;;  %2138 = vmatmul.msk.f32.gmra.mxu2 %vm494_vm1, %v748_v59 }
  0x4f   : > { %2143 = vmatmul.msk.f32.gmra.mxu3 %vm494_vm1, %v748_v59 }
  0x52   : > { %2157 = vmatmul.msk.f32.vlgmr.msra.gmra.mxu0 %vm494_vm1, %v846_v63 }
  0x53   : > { %2122 = vmatmul.msk.f32.vlgmr.msra.gmra.mxu1 %vm494_vm1, %v648_v42  ;;  %2139 = vmatmul.msk.f32.gmra.mxu2 %vm494_vm1, %v749_v1 }
  0x57   : > { %2144 = vmatmul.msk.f32.gmra.mxu3 %vm494_vm1, %v749_v1 }
  0x5a   : > { %2158 = vmatmul.msk.f32.gmra.mxu0 %vm494_vm1, %v847_v2 }
  0x5b   : > { %2123 = vmatmul.msk.f32.gmra.mxu1 %vm494_vm1, %v649_v52  ;;  %2140 = vmatmul.msk.f32.gmra.mxu2 %vm494_vm1, %v750_v3 }
  0x5f   : > { %2145 = vmatmul.msk.f32.gmra.mxu3 %vm494_vm1, %v750_v3 }
  0x62   : > { %2159 = vmatmul.msk.f32.gmra.mxu0 %vm494_vm1, %v848_v4 }
  0x63   : > { %2124 = vmatmul.msk.f32.gmra.mxu1 %vm494_vm1, %v650_v55 }
  0x6a   : > { %2160 = vmatmul.msk.f32.gmra.mxu0 %vm494_vm1, %v849_v5 }
  0x6b   : > { %2125 = vmatmul.msk.f32.gmra.mxu1 %vm494_vm1, %v651_v58 }
  0x73   : > { %2162 = vmatmul.msk.f32.vlgmr.msrb.gmra.mxu1 %vm494_vm1, %v846_v63 }
  0x7b   : > { %2163 = vmatmul.msk.f32.gmra.mxu1 %vm494_vm1, %v847_v2 }
  0x83   : > { %2164 = vmatmul.msk.f32.gmra.mxu1 %vm494_vm1, %v848_v4 }
  0x8b   : > { %2165 = vmatmul.msk.f32.gmra.mxu1 %vm494_vm1, %v849_v5  ;;  %v2876_v5 = vld [vmem:[%s3704_s2 + $0x18] sm:$0x3f] }
  0x9f   : > { %v531_v6 = vpop.f32.mrf.mxu0 }
  0xa0   : > { %v537_v7 = vpop.f32.mrf.mxu1 }
  0xa6   : > { %v607_v8 = vpop.f32.mrf.mxu2 }
  0xa7   : > { %v534_v9 = vpop.f32.mrf.mxu0  ;;  %v608_v36 = vadd.f32 %v607_v8, %v531_v6 }
  0xa8   : > { %v540_v10 = vpop.f32.mrf.mxu1 }
  0xaa   : > { %v2841_v19 = vpop.f32.mrf.mxu3 }
  0xae   : > { %v610_v11 = vpop.f32.mrf.mxu2 }
  0xaf   : > { %v698_v12 = vpop.f32.mrf.mxu0  ;;  %v611_v34 = vadd.f32 %v610_v11, %v534_v9 }
  0xb0   : > { %v2837_v13 = vpop.f32.mrf.mxu1  ;;  %v739_v43 = vadd.f32 %v698_v12, %v608_v36  ;;  %v1084_v36 = vld [vmem:[%s3705_s3 + $0x50] sm:$0xff] }
  0xb2   : > { %v2845_v24 = vpop.f32.mrf.mxu3 }
  0xb6   : > { %v613_v14 = vpop.f32.mrf.mxu2 }
  0xb7   : > { %v701_v15 = vpop.f32.mrf.mxu0  ;;  %v614_v37 = vadd.f32 %v613_v14, %v537_v7 }
  0xb8   : > { %v2839_v16 = vpop.f32.mrf.mxu1  ;;  %v741_v40 = vadd.f32 %v701_v15, %v611_v34  ;;  %v1085_v34 = vld [vmem:[%s3705_s3 + $0x58] sm:$0xff] }
  0xb9   : > { %v640_v6 = vadd.f32 %v2845_v24, %v2839_v16  ;;  %v1089_v24 = vld [vmem:[%s3705_s3 + $0x78] sm:$0xff] }
  0xba   : > { %v642_v28 = vpop.f32.mrf.mxu3  ;;  %1102 = vmatpush.msrb.mxu0 %v1089_v24 }
  0xbe   : > { %v616_v17 = vpop.f32.mrf.mxu2 }
  0xbf   : > { %v704_v18 = vpop.f32.mrf.mxu0  ;;  %v617_v38 = vadd.f32 %v616_v17, %v540_v10  ;;  %v637_v10 = vadd.f32 %v2841_v19, %v2837_v13  ;;  %v2197_v13 = vld [vmem:[%s3705_s3 + $0x120] sm:$0xff]  ;;  %v1088_v19 = vld [vmem:[%s3705_s3 + $0x70] sm:$0xff] }
  0xc0   : > { %v2843_v20 = vpop.f32.mrf.mxu1  ;;  %v743_v41 = vadd.f32 %v704_v18, %v614_v37  ;;  %1103 = vmatpush.msrb.mxu0 %v1088_v19  ;;  %v2192_v37 = vld [vmem:[%s3705_s3 + $0xf8] sm:$0xff] }
  0xc1   : > { %v643_v3 = vadd.f32 %v642_v28, %v2843_v20  ;;  %v1087_v28 = vld [vmem:[%s3705_s3 + $0x68] sm:$0xff]  ;;  %v2222_v19 = vld [vmem:[%s3706_s4 + $0x138] sm:$0xff] }
  0xc2   : > { %v645_v32 = vpop.f32.mrf.mxu3  ;;  %1104 = vmatpush.msrb.mxu0 %v1087_v28  ;;  %v1229_v28 = vld [vmem:[%s3706_s4 + $0x58] sm:$0xff] }
  0xc6   : > { %v797_v21 = vpop.f32.mrf.mxu2 }
  0xc7   : > { %v707_v22 = vpop.f32.mrf.mxu0  ;;  %v838_v52 = vadd.f32 %v797_v21, %v739_v43  ;;  %v2189_v43 = vld [vmem:[%s3705_s3 + $0xe0] sm:$0xff] }
  0xc8   : > { %v569_v23 = vpop.f32.mrf.mxu1  ;;  %v745_v42 = vadd.f32 %v707_v22, %v617_v38  ;;  %v1083_v38 = vld [vmem:[%s3705_s3 + $0x48] sm:$0xff] }
  0xc9   : > { %v646_v4 = vadd.f32 %v645_v32, %v569_v23 }
  0xca   : > { %v826_v44 = vpop.f32.mrf.mxu3 }
  0xce   : > { %v800_v25 = vpop.f32.mrf.mxu2 }
  0xcf   : > { %v896_v26 = vpop.f32.mrf.mxu0  ;;  %v840_v48 = vadd.f32 %v800_v25, %v741_v40  ;;  %v1082_v40 = vld [vmem:[%s3705_s3 + $0x40] sm:$0xff] }
  0xd0   : > { %v2847_v27 = vpop.f32.mrf.mxu1  ;;  %v937_v55 = vadd.f32 %v896_v26, %v838_v52  ;;  %v1076_v52 = vld [vmem:[%s3705_s3 + $0x10] sm:$0xff] }
  0xd1   : > { %v740_v12 = vadd.f32 %v2847_v27, %v637_v10  ;;  %v2196_v27 = vld [vmem:[%s3705_s3 + $0x118] sm:$0xff]  ;;  %v1238_v10 = vld [vmem:[%s3706_s4 + $0xa0] sm:$0xf] }
  0xd2   : > { %v945_v58 = vmax.f32 %v937_v55, 0.0  ;;  %v829_v59 = vpop.f32.mrf.mxu3  ;;  %v1075_v55 = vld [vmem:[%s3705_s3 + $0x8] sm:$0xff] }
  0xd3   : > { %v839_v16 = vadd.f32 %v826_v44, %v740_v12  ;;  %v1080_v44 = vld [vmem:[%s3705_s3 + $0x30] sm:$0xff] }
  0xd4   : > { %v1236_v12 = vld [vmem:[%s3706_s4 + $0x90] sm:$0xff] }
  0xd6   : > { %v803_v31 = vpop.f32.mrf.mxu2 }
  0xd7   : > { %v899_v29 = vpop.f32.mrf.mxu0  ;;  %v842_v45 = vadd.f32 %v803_v31, %v743_v41  ;;  %v1086_v31 = vld [vmem:[%s3705_s3 + $0x60] sm:$0xff]  ;;  %v2190_v41 = vld [vmem:[%s3705_s3 + $0xe8] sm:$0xff] }
  0xd8   : > { %v2849_v30 = vpop.f32.mrf.mxu1  ;;  %v939_v53 = vadd.f32 %v899_v29, %v840_v48  ;;  %1105 = vmatpush.msrb.mxu0 %v1086_v31  ;;  %v1078_v48 = vld [vmem:[%s3705_s3 + $0x20] sm:$0xff] }
  0xd9   : > { %v742_v11 = vadd.f32 %v2849_v30, %v640_v6  ;;  %v2195_v30 = vld [vmem:[%s3705_s3 + $0x110] sm:$0xff] }
  0xda   : > { %v947_v57 = vmax.f32 %v939_v53, 0.0  ;;  %v832_v1 = vpop.f32.mrf.mxu3  ;;  %1106 = vmatpush.msrb.mxu0 %v1085_v34  ;;  %v2184_v53 = vld [vmem:[%s3705_s3 + $0xb8] sm:$0xff]  ;;  %v2219_v34 = vld [vmem:[%s3706_s4 + $0x120] sm:$0xff] }
  0xdb   : > { %v841_v18 = vadd.f32 %v829_v59, %v742_v11  ;;  %v1239_v11 = vld [vmem:[%s3706_s4 + $0xa8] sm:$0xf] }
  0xdc   : > { %1107 = vmatpush.msrb.mxu0 %v1084_v36  ;;  %v1226_v36 = vld [vmem:[%s3706_s4 + $0x40] sm:$0xff] }
  0xde   : > { %v806_v39 = vpop.f32.mrf.mxu2  ;;  %1108 = vmatpush.msrb.mxu0 %v1083_v38  ;;  %v2217_v38 = vld [vmem:[%s3706_s4 + $0x110] sm:$0xff] }
  0xdf   : > { %v902_v33 = vpop.f32.mrf.mxu0  ;;  %v844_v46 = vadd.f32 %v806_v39, %v745_v42  ;;  %v2191_v39 = vld [vmem:[%s3705_s3 + $0xf0] sm:$0xff]  ;;  %v1081_v42 = vld [vmem:[%s3705_s3 + $0x38] sm:$0xff] }
  0xe0   : > { %v733_v35 = vpop.f32.mrf.mxu1  ;;  %v941_v49 = vadd.f32 %v902_v33, %v842_v45  ;;  %v2194_v33 = vld [vmem:[%s3705_s3 + $0x108] sm:$0xff]  ;;  %1109 = vmatpush.msrb.mxu0 %v1082_v40  ;;  %v2188_v45 = vld [vmem:[%s3705_s3 + $0xd8] sm:$0xff]  ;;  %v1224_v40 = vld [vmem:[%s3706_s4 + $0x30] sm:$0xff] }
  0xe1   : > { %v744_v7 = vadd.f32 %v733_v35, %v643_v3  ;;  %v2193_v35 = vld [vmem:[%s3705_s3 + $0x100] sm:$0xff]  ;;  %v2200_v3 = vld [vmem:[%s3705_s3 + $0x138] sm:$0xff] }
  0xe2   : > { %v949_v56 = vmax.f32 %v941_v49, 0.0  ;;  %v835_v9 = vpop.f32.mrf.mxu3  ;;  %1110 = vmatpush.msrb.mxu0 %v1081_v42  ;;  %v2186_v49 = vld [vmem:[%s3705_s3 + $0xc8] sm:$0xff]  ;;  %v2215_v42 = vld [vmem:[%s3706_s4 + $0x100] sm:$0xff] }
  0xe3   : > { %v843_v14 = vadd.f32 %v832_v1, %v744_v7  ;;  %v2201_v1 = vld [vmem:[%s3705_s3 + $0x140] sm:$0xff] }
  0xe4   : > { %1111 = vmatpush.msrb.mxu0 %v1080_v44  ;;  %v1090_v7 = vld [vmem:[%s3705_s3 + $0x80] sm:$0xff] }
  0xe5   : > { %v1222_v44 = vld [vmem:[%s3706_s4 + $0x20] sm:$0xff] }
  0xe7   : > { %v905_v47 = vpop.f32.mrf.mxu0 }
  0xe8   : > { %v736_v50 = vpop.f32.mrf.mxu1  ;;  %v943_v51 = vadd.f32 %v905_v47, %v844_v46  ;;  %v1079_v46 = vld [vmem:[%s3705_s3 + $0x28] sm:$0xff]  ;;  %v2187_v47 = vld [vmem:[%s3705_s3 + $0xd0] sm:$0xff] }
  0xe9   : > { %v746_v8 = vadd.f32 %v736_v50, %v646_v4  ;;  %1112 = vmatpush.msrb.mxu0 %v1079_v46  ;;  %v1077_v50 = vld [vmem:[%s3705_s3 + $0x18] sm:$0xff]  ;;  %v1091_v4 = vld [vmem:[%s3705_s3 + $0x88] sm:$0xff]  ;;  %v2213_v46 = vld [vmem:[%s3706_s4 + $0xf0] sm:$0xff] }
  0xea   : > { %v951_v54 = vmax.f32 %v943_v51, 0.0  ;;  %v2185_v51 = vld [vmem:[%s3705_s3 + $0xc0] sm:$0xff] }
  0xeb   : > { %v845_v15 = vadd.f32 %v835_v9, %v746_v8  ;;  %1113 = vmatpush.msrb.mxu0 %v1078_v48  ;;  %v2198_v8 = vld [vmem:[%s3705_s3 + $0x128] sm:$0xff]  ;;  %v1220_v48 = vld [vmem:[%s3706_s4 + $0x10] sm:$0xff] }
  0xec   : > { %2166 = vmatpush.msk.msra.mxu1 %vm962_vm2, %v951_v54  ;;  %2363 = vmatpush.msk.msra.mxu2 %vm962_vm2, %v951_v54 }
  0xed   : > { %1114 = vmatpush.msrb.mxu0 %v1077_v50  ;;  %v2211_v50 = vld [vmem:[%s3706_s4 + $0xe0] sm:$0xff] }
  0xee   : > { %982 = vmatpush.msra.mxu1 %v949_v56  ;;  %2364 = vmatpush.msra.mxu2 %v949_v56 }
  0xef   : > { %1115 = vmatpush.msrb.mxu0 %v1076_v52  ;;  %v1218_v52 = vld [vmem:[%s3706_s4] sm:$0xff] }
  0xf0   : > { %v925_v60 = vpop.f32.mrf.mxu1  ;;  %983 = vmatpush.msra.mxu1 %v947_v57  ;;  %2365 = vmatpush.msra.mxu2 %v947_v57 }
  0xf1   : > { %v938_v25 = vadd.f32 %v925_v60, %v839_v16  ;;  %1116 = vmatpush.msrb.mxu0 %v1075_v55  ;;  %v1094_v60 = vld [vmem:[%s3705_s3 + $0xa0] sm:$0xff]  ;;  %v2224_v16 = vld [vmem:[%s3706_s4 + $0x148] sm:$0xff]  ;;  %v2288_v55 = vld [vmem:[%s3706_s4 + $0x2b8] sm:$0xf] }
  0xf2   : > { %984 = vmatpush.msra.mxu1 %v945_v58  ;;  %2366 = vmatpush.msra.mxu2 %v945_v58 }
  0xf3   : > { %2168 = vmatmul.msk.f32.vlgmr.msra.gmra.mxu2 %vm955_vm3, %v2856_v61  ;;  %2167 = vmatmul.msk.f32.vlgmr.msra.gmra.mxu1 %vm955_vm3, %v953_v62  ;;  %v946_v32 = vmax.f32 %v938_v25, 0.0  ;;  %v1230_v25 = vld [vmem:[%s3706_s4 + $0x60] sm:$0xff] }
  0xf4   : > { %2174 = vmatpush.msk.msrb.mxu2 %vm962_vm2, %v951_v54  ;;  %1136 = vmatpush.msrb.mxu1 %v1094_v60  ;;  %v2207_v60 = vld [vmem:[%s3706_s4 + $0xc0] sm:$0xff] }
  0xf6   : > { %1037 = vmatpush.msrb.mxu2 %v949_v56  ;;  %v2183_v56 = vld [vmem:[%s3705_s3 + $0xb0] sm:$0xff] }
  0xf8   : > { %1038 = vmatpush.msrb.mxu2 %v947_v57  ;;  %v928_v63 = vpop.f32.mrf.mxu1  ;;  %v1074_v57 = vld [vmem:[%s3705_s3] sm:$0xff] }
  0xf9   : > { %v940_v22 = vadd.f32 %v928_v63, %v841_v18  ;;  %1117 = vmatpush.msrb.mxu0 %v1074_v57  ;;  %v1093_v63 = vld [vmem:[%s3705_s3 + $0x98] sm:$0xff]  ;;  %v2225_v18 = vld [vmem:[%s3706_s4 + $0x150] sm:$0xf] }
  0xfa   : > { %1039 = vmatpush.msrb.mxu2 %v945_v58  ;;  %v2182_v58 = vld [vmem:[%s3705_s3 + $0xa8] sm:$0xff]  ;;  %1137 = vmatpush.msrb.mxu1 %v1093_v63  ;;  %v2210_v57 = vld [vmem:[%s3706_s4 + $0xd8] sm:$0xff] }
  0xfb   : > { %2175 = vmatmul.msk.f32.vlgmr.msrb.gmra.mxu2 %vm955_vm3, %v2868_v0  ;;  %v948_v29 = vmax.f32 %v940_v22, 0.0  ;;  %2227 = vmatpush.msk.msra.mxu0 %vm962_vm2, %v2225_v18  ;;  %v1232_v22 = vld [vmem:[%s3706_s4 + $0x70] sm:$0xff]  ;;  %v2284_v63 = vld [vmem:[%s3706_s4 + $0x298] sm:$0xff] }
  0xfc   : > { %1170 = vmatpush.msra.mxu2 %v2197_v13  ;;  %v2221_v13 = vld [vmem:[%s3706_s4 + $0x130] sm:$0xff] }
  0xfd   : > { %v2275_v18 = vld [vmem:[%s3706_s4 + $0x250] sm:$0xff] }
  0xfe   : > { %1171 = vmatpush.msra.mxu2 %v2196_v27  ;;  %v1228_v27 = vld [vmem:[%s3706_s4 + $0x50] sm:$0xff] }
 0x100   : > { %v931_v2 = vpop.f32.mrf.mxu1  ;;  %1172 = vmatpush.msra.mxu2 %v2195_v30 }
 0x101   : > { %v942_v20 = vadd.f32 %v931_v2, %v843_v14  ;;  %v1092_v2 = vld [vmem:[%s3705_s3 + $0x90] sm:$0xff]  ;;  %v1237_v14 = vld [vmem:[%s3706_s4 + $0x98] sm:$0xff] }
 0x102   : > { %1173 = vmatpush.msra.mxu2 %v2194_v33  ;;  %1138 = vmatpush.msrb.mxu1 %v1092_v2  ;;  %v2259_v2 = vld [vmem:[%s3706_s4 + $0x200] sm:$0xf] }
 0x103   : > { %2176 = vmatmul.msk.f32.gmra.mxu2 %vm955_vm3, %v2876_v5  ;;  %v950_v26 = vmax.f32 %v942_v20, 0.0  ;;  %v2226_v20 = vld [vmem:[%s3706_s4 + $0x158] sm:$0xf] }
 0x104   : > { %1174 = vmatpush.msra.mxu2 %v2193_v35  ;;  %1139 = vmatpush.msrb.mxu1 %v1091_v4  ;;  %v2220_v35 = vld [vmem:[%s3706_s4 + $0x128] sm:$0xff]  ;;  %v2281_v4 = vld [vmem:[%s3706_s4 + $0x280] sm:$0xff] }
 0x106   : > { %1175 = vmatpush.msra.mxu2 %v2192_v37  ;;  %1140 = vmatpush.msrb.mxu1 %v1090_v7  ;;  %v1227_v37 = vld [vmem:[%s3706_s4 + $0x48] sm:$0xff]  ;;  %v2258_v7 = vld [vmem:[%s3706_s4 + $0x1f8] sm:$0xff] }
 0x108   : > { %v934_v17 = vpop.f32.mrf.mxu1  ;;  %1176 = vmatpush.msra.mxu2 %v2191_v39  ;;  %2230 = vmatpush.msk.msra.mxu1 %vm962_vm2, %v2226_v20  ;;  %v2218_v39 = vld [vmem:[%s3706_s4 + $0x118] sm:$0xff] }
 0x109   : > { %v944_v21 = vadd.f32 %v934_v17, %v845_v15  ;;  %v1234_v15 = vld [vmem:[%s3706_s4 + $0x80] sm:$0xff]  ;;  %v1235_v17 = vld [vmem:[%s3706_s4 + $0x88] sm:$0xff]  ;;  %v2276_v20 = vld [vmem:[%s3706_s4 + $0x258] sm:$0xff] }
 0x10a   : > { %1177 = vmatpush.msra.mxu2 %v2190_v41  ;;  %1309 = vmatpush.msra.mxu1 %v2224_v16  ;;  %v1225_v41 = vld [vmem:[%s3706_s4 + $0x38] sm:$0xff]  ;;  %v2252_v16 = vld [vmem:[%s3706_s4 + $0x1c8] sm:$0xff] }
 0x10b   : > { %v952_v23 = vmax.f32 %v944_v21, 0.0  ;;  %v2223_v21 = vld [vmem:[%s3706_s4 + $0x140] sm:$0xff] }
 0x10c   : > { %1178 = vmatpush.msra.mxu2 %v2189_v43  ;;  %1286 = vmatpush.msra.mxu0 %v2223_v21  ;;  %v2216_v43 = vld [vmem:[%s3706_s4 + $0x108] sm:$0xff]  ;;  %v2251_v21 = vld [vmem:[%s3706_s4 + $0x1c0] sm:$0xff] }
 0x10d   : > { %2169 = vmatpush.msk.msra.mxu3 %vm962_vm2, %v952_v23  ;;  %1310 = vmatpush.msra.mxu1 %v2222_v19  ;;  %v2271_v19 = vld [vmem:[%s3706_s4 + $0x230] sm:$0xff] }
 0x10e   : > { %1179 = vmatpush.msra.mxu2 %v2188_v45  ;;  %1287 = vmatpush.msra.mxu0 %v2221_v13  ;;  %v1223_v45 = vld [vmem:[%s3706_s4 + $0x28] sm:$0xff]  ;;  %v2250_v13 = vld [vmem:[%s3706_s4 + $0x1b8] sm:$0xff] }
 0x10f   : > { %1005 = vmatpush.msra.mxu3 %v950_v26  ;;  %1311 = vmatpush.msra.mxu1 %v2220_v35  ;;  %v2244_v35 = vld [vmem:[%s3706_s4 + $0x188] sm:$0xff] }
 0x110   : > { %1180 = vmatpush.msra.mxu2 %v2187_v47  ;;  %1288 = vmatpush.msra.mxu0 %v2219_v34  ;;  %v2214_v47 = vld [vmem:[%s3706_s4 + $0xf8] sm:$0xff]  ;;  %v2243_v34 = vld [vmem:[%s3706_s4 + $0x180] sm:$0xff] }
 0x111   : > { %1006 = vmatpush.msra.mxu3 %v948_v29  ;;  %1312 = vmatpush.msra.mxu1 %v2218_v39  ;;  %v2240_v39 = vld [vmem:[%s3706_s4 + $0x168] sm:$0xff] }
 0x112   : > { %1181 = vmatpush.msra.mxu2 %v2186_v49  ;;  %1289 = vmatpush.msra.mxu0 %v2217_v38  ;;  %v1221_v49 = vld [vmem:[%s3706_s4 + $0x18] sm:$0xff]  ;;  %v2239_v38 = vld [vmem:[%s3706_s4 + $0x160] sm:$0xff] }
 0x113   : > { %1007 = vmatpush.msra.mxu3 %v946_v32  ;;  %1313 = vmatpush.msra.mxu1 %v2216_v43 }
 0x114   : > { %2170 = vmatmul.msk.f32.vlgmr.msra.gmra.mxu3 %vm955_vm3, %v953_v62  ;;  %1182 = vmatpush.msra.mxu2 %v2185_v51  ;;  %v2212_v51 = vld [vmem:[%s3706_s4 + $0xe8] sm:$0xff] }
 0x115   : > { %2177 = vmatpush.msk.msrb.mxu3 %vm962_vm2, %v952_v23  ;;  %v1233_v23 = vld [vmem:[%s3706_s4 + $0x78] sm:$0xff]  ;;  %1290 = vmatpush.msra.mxu0 %v2215_v42 }
 0x116   : > { %1183 = vmatpush.msra.mxu2 %v2184_v53  ;;  %1314 = vmatpush.msra.mxu1 %v2214_v47  ;;  %v1219_v53 = vld [vmem:[%s3706_s4 + $0x8] sm:$0xff] }
 0x117   : > { %1060 = vmatpush.msrb.mxu3 %v950_v26  ;;  %v1231_v26 = vld [vmem:[%s3706_s4 + $0x68] sm:$0xff]  ;;  %1291 = vmatpush.msra.mxu0 %v2213_v46 }
 0x118   : > { %1184 = vmatpush.msra.mxu2 %v2183_v56  ;;  %1315 = vmatpush.msra.mxu1 %v2212_v51  ;;  %v2209_v56 = vld [vmem:[%s3706_s4 + $0xd0] sm:$0xff] }
 0x119   : > { %1061 = vmatpush.msrb.mxu3 %v948_v29  ;;  %1292 = vmatpush.msra.mxu0 %v2211_v50 }
 0x11a   : > { %1185 = vmatpush.msra.mxu2 %v2182_v58  ;;  %v2285_v58 = vld [vmem:[%s3706_s4 + $0x2a0] sm:$0xff]  ;;  %1316 = vmatpush.msra.mxu1 %v2210_v57  ;;  %v2316_v57 = vld [vmem:[%s3706_s4 + $0x368] sm:$0xf] }
 0x11b   : > { %1062 = vmatpush.msrb.mxu3 %v946_v32  ;;  %1293 = vmatpush.msra.mxu0 %v2209_v56  ;;  %v2315_v56 = vld [vmem:[%s3706_s4 + $0x360] sm:$0xf] }
 0x11c   : > { %2171 = vmatmul.msk.f32.gmra.mxu3 %vm955_vm3, %v2856_v61  ;;  %v2202_v61 = vld [vmem:[%s3705_s3 + $0x148] sm:$0xff]  ;;  %2236 = vmatpush.msk.msrb.mxu2 %vm962_vm2, %v1239_v11 }
 0x11d   : > { %1204 = vmatpush.msra.mxu3 %v2202_v61  ;;  %v2208_v61 = vld [vmem:[%s3706_s4 + $0xc8] sm:$0xff]  ;;  %1294 = vmatpush.msra.mxu0 %v2207_v60  ;;  %v2313_v60 = vld [vmem:[%s3706_s4 + $0x350] sm:$0xff] }
 0x11e   : > { %1365 = vmatpush.msrb.mxu2 %v1237_v14  ;;  %1317 = vmatpush.msra.mxu1 %v2208_v61  ;;  %v2256_v11 = vld [vmem:[%s3706_s4 + $0x1e8] sm:$0xff]  ;;  %v2314_v61 = vld [vmem:[%s3706_s4 + $0x358] sm:$0xff] }
 0x11f   : > { %1205 = vmatpush.msra.mxu3 %v2201_v1  ;;  %v2206_v1 = vld [vmem:[%s3706_s4 + $0xb8] sm:$0xff]  ;;  %v2278_v14 = vld [vmem:[%s3706_s4 + $0x268] sm:$0xff] }
 0x120   : > { %1366 = vmatpush.msrb.mxu2 %v1235_v17  ;;  %1318 = vmatpush.msra.mxu1 %v2206_v1  ;;  %v2254_v17 = vld [vmem:[%s3706_s4 + $0x1d8] sm:$0xff] }
 0x121   : > { %1206 = vmatpush.msra.mxu3 %v2200_v3  ;;  %v2260_v3 = vld [vmem:[%s3706_s4 + $0x208] sm:$0xf] }
 0x122   : > { %1367 = vmatpush.msrb.mxu2 %v1233_v23  ;;  %v2274_v23 = vld [vmem:[%s3706_s4 + $0x248] sm:$0xff] }
 0x124   : > { %2178 = vmatmul.msk.f32.vlgmr.msrb.gmra.mxu3 %vm955_vm3, %v2868_v0  ;;  %1368 = vmatpush.msrb.mxu2 %v1231_v26  ;;  %v2247_v26 = vld [vmem:[%s3706_s4 + $0x1a0] sm:$0xff] }
 0x126   : > { %1369 = vmatpush.msrb.mxu2 %v1229_v28  ;;  %v2269_v28 = vld [vmem:[%s3706_s4 + $0x220] sm:$0xff] }
 0x128   : > { %1370 = vmatpush.msrb.mxu2 %v1227_v37  ;;  %v2242_v37 = vld [vmem:[%s3706_s4 + $0x178] sm:$0xff] }
 0x12a   : > { %1371 = vmatpush.msrb.mxu2 %v1225_v41 }
 0x12c   : > { %2179 = vmatmul.msk.f32.gmra.mxu3 %vm955_vm3, %v2876_v5  ;;  %v2199_v5 = vld [vmem:[%s3705_s3 + $0x130] sm:$0xff]  ;;  %1372 = vmatpush.msrb.mxu2 %v1223_v45 }
 0x12d   : > { %1207 = vmatpush.msra.mxu3 %v2199_v5  ;;  %v2282_v5 = vld [vmem:[%s3706_s4 + $0x288] sm:$0xff] }
 0x12e   : > { %1373 = vmatpush.msrb.mxu2 %v1221_v49 }
 0x12f   : > { %1208 = vmatpush.msra.mxu3 %v2198_v8  ;;  %v2279_v8 = vld [vmem:[%s3706_s4 + $0x270] sm:$0xff] }
 0x130   : > { %1374 = vmatpush.msrb.mxu2 %v1219_v53 }
 0x131   : > { %2233 = vmatpush.msk.msrb.mxu3 %vm962_vm2, %v1238_v10  ;;  %v2255_v10 = vld [vmem:[%s3706_s4 + $0x1e0] sm:$0xff] }
 0x133   : > { %1342 = vmatpush.msrb.mxu3 %v1236_v12  ;;  %v2277_v12 = vld [vmem:[%s3706_s4 + $0x260] sm:$0xff] }
 0x135   : > { %1343 = vmatpush.msrb.mxu3 %v1234_v15  ;;  %v2253_v15 = vld [vmem:[%s3706_s4 + $0x1d0] sm:$0xff] }
 0x137   : > { %1344 = vmatpush.msrb.mxu3 %v1232_v22  ;;  %v2273_v22 = vld [vmem:[%s3706_s4 + $0x240] sm:$0xff] }
 0x139   : > { %1345 = vmatpush.msrb.mxu3 %v1230_v25  ;;  %v2272_v25 = vld [vmem:[%s3706_s4 + $0x238] sm:$0xff] }
 0x13b   : > { %1346 = vmatpush.msrb.mxu3 %v1228_v27  ;;  %v2248_v27 = vld [vmem:[%s3706_s4 + $0x1a8] sm:$0xff] }
 0x13d   : > { %1347 = vmatpush.msrb.mxu3 %v1226_v36  ;;  %v2241_v36 = vld [vmem:[%s3706_s4 + $0x170] sm:$0xff] }
 0x13f   : > { %1348 = vmatpush.msrb.mxu3 %v1224_v40 }
 0x141   : > { %1349 = vmatpush.msrb.mxu3 %v1222_v44 }
 0x143   : > { %1350 = vmatpush.msrb.mxu3 %v1220_v48 }
 0x145   : > { %1351 = vmatpush.msrb.mxu3 %v1218_v52 }
 0x170   : > { %v986_v59 = vpop.f32.mrf.mxu1 }
 0x176   : > { %v989_v54 = vpop.f32.mrf.mxu2 }
 0x17e   : > { %v1041_v62 = vpop.f32.mrf.mxu2 }
 0x17f   : > { %v1070_v0 = vmax.f32 %v986_v59, %v1041_v62  ;;  %v2286_v59 = vld [vmem:[%s3706_s4 + $0x2a8] sm:$0xff]  ;;  %v2283_v62 = vld [vmem:[%s3706_s4 + $0x290] sm:$0xff] }
 0x181   : > { %1118 = vmatmul.f32.vlgmr.msrb.gmra.mxu0 %v1070_v0  ;;  %1186 = vmatmul.f32.vlgmr.msra.gmra.mxu2 %v1070_v0  ;;  %v2205_v0 = vld [vmem:[%s3706_s4 + $0xb0] sm:$0xff] }
 0x182   : > { %2292 = vmatpush.msk.msra.mxu2 %vm962_vm2, %v2288_v55  ;;  %1295 = vmatpush.msra.mxu0 %v2205_v0  ;;  %v2312_v0 = vld [vmem:[%s3706_s4 + $0x348] sm:$0xff] }
 0x184   : > { %1535 = vmatpush.msra.mxu2 %v2286_v59  ;;  %2261 = vmatpush.msk.msrb.mxu0 %vm962_vm2, %v2259_v2  ;;  %v2309_v2 = vld [vmem:[%s3706_s4 + $0x330] sm:$0xff] }
 0x186   : > { %v1044_v6 = vpop.f32.mrf.mxu2  ;;  %1536 = vmatpush.msra.mxu2 %v2284_v63  ;;  %v2311_v63 = vld [vmem:[%s3706_s4 + $0x340] sm:$0xff] }
 0x187   : > { %v1072_v9 = vmax.f32 %v989_v54, %v1044_v6  ;;  %v2287_v54 = vld [vmem:[%s3706_s4 + $0x2b0] sm:$0xf] }
 0x188   : > { %v2257_v6 = vld [vmem:[%s3706_s4 + $0x1f0] sm:$0xff]  ;;  %1537 = vmatpush.msra.mxu2 %v2282_v5  ;;  %v2308_v5 = vld [vmem:[%s3706_s4 + $0x328] sm:$0xff] }
 0x189   : > { %1121 = vmatmul.f32.gmra.mxu0 %v1072_v9  ;;  %1189 = vmatmul.f32.gmra.mxu2 %v1072_v9  ;;  %v2280_v9 = vld [vmem:[%s3706_s4 + $0x278] sm:$0xff] }
 0x18a   : > { %1425 = vmatpush.msrb.mxu0 %v2257_v6  ;;  %1538 = vmatpush.msra.mxu2 %v2280_v9 }
 0x18c   : > { %1426 = vmatpush.msrb.mxu0 %v2255_v10  ;;  %1539 = vmatpush.msra.mxu2 %v2278_v14  ;;  %v2303_v10 = vld [vmem:[%s3706_s4 + $0x300] sm:$0xff]  ;;  %v2301_v14 = vld [vmem:[%s3706_s4 + $0x2f0] sm:$0xff] }
 0x18e   : > { %1427 = vmatpush.msrb.mxu0 %v2253_v15  ;;  %1540 = vmatpush.msra.mxu2 %v2276_v20  ;;  %v2302_v15 = vld [vmem:[%s3706_s4 + $0x2f8] sm:$0xff]  ;;  %v2297_v20 = vld [vmem:[%s3706_s4 + $0x2d0] sm:$0xff] }
 0x190   : > { %1428 = vmatpush.msrb.mxu0 %v2251_v21  ;;  %1541 = vmatpush.msra.mxu2 %v2274_v23  ;;  %v2298_v21 = vld [vmem:[%s3706_s4 + $0x2d8] sm:$0xff] }
 0x192   : > { %1542 = vmatpush.msra.mxu2 %v2272_v25 }
 0x197   : > { %v1009_v24 = vpop.f32.mrf.mxu3 }
 0x19f   : > { %v1012_v29 = vpop.f32.mrf.mxu3 }
 0x1a7   : > { %v1064_v30 = vpop.f32.mrf.mxu3 }
 0x1a8   : > { %v1071_v31 = vmax.f32 %v1009_v24, %v1064_v30  ;;  %v2249_v24 = vld [vmem:[%s3706_s4 + $0x1b0] sm:$0xff] }
 0x1a9   : > { %1429 = vmatpush.msrb.mxu0 %v2249_v24  ;;  %v2245_v30 = vld [vmem:[%s3706_s4 + $0x190] sm:$0xff] }
 0x1aa   : > { %2180 = vmatmul.msk.f32.vlgmr.msrb.gmra.mxu1 %vm1095_vm4, %v1071_v31  ;;  %2203 = vmatmul.msk.f32.vlgmr.msra.gmra.mxu3 %vm1095_vm4, %v1071_v31  ;;  %v2246_v31 = vld [vmem:[%s3706_s4 + $0x198] sm:$0xff] }
 0x1ab   : > { %2289 = vmatpush.msk.msra.mxu3 %vm962_vm2, %v2287_v54  ;;  %2264 = vmatpush.msk.msrb.mxu1 %vm962_vm2, %v2260_v3  ;;  %v2310_v3 = vld [vmem:[%s3706_s4 + $0x338] sm:$0xff] }
 0x1ac   : > { %1430 = vmatpush.msrb.mxu0 %v2247_v26 }
 0x1ad   : > { %1512 = vmatpush.msra.mxu3 %v2285_v58  ;;  %1448 = vmatpush.msrb.mxu1 %v2258_v7  ;;  %v2305_v7 = vld [vmem:[%s3706_s4 + $0x310] sm:$0xff] }
 0x1ae   : > { %1431 = vmatpush.msrb.mxu0 %v2245_v30 }
 0x1af   : > { %v1067_v32 = vpop.f32.mrf.mxu3  ;;  %1513 = vmatpush.msra.mxu3 %v2283_v62  ;;  %1449 = vmatpush.msrb.mxu1 %v2256_v11  ;;  %v2304_v11 = vld [vmem:[%s3706_s4 + $0x308] sm:$0xff] }
 0x1b0   : > { %v1073_v33 = vmax.f32 %v1012_v29, %v1067_v32  ;;  %v2270_v29 = vld [vmem:[%s3706_s4 + $0x228] sm:$0xff]  ;;  %v2267_v32 = vld [vmem:[%s3706_s4 + $0x210] sm:$0xff]  ;;  %1432 = vmatpush.msrb.mxu0 %v2243_v34 }
 0x1b1   : > { %1514 = vmatpush.msra.mxu3 %v2281_v4  ;;  %1450 = vmatpush.msrb.mxu1 %v2254_v17  ;;  %v2307_v4 = vld [vmem:[%s3706_s4 + $0x320] sm:$0xff] }
 0x1b2   : > { %2181 = vmatmul.msk.f32.gmra.mxu1 %vm1095_vm4, %v1073_v33  ;;  %2204 = vmatmul.msk.f32.gmra.mxu3 %vm1095_vm4, %v1073_v33  ;;  %v2268_v33 = vld [vmem:[%s3706_s4 + $0x218] sm:$0xff]  ;;  %v2299_v17 = vld [vmem:[%s3706_s4 + $0x2e0] sm:$0xff] }
 0x1b3   : > { %1515 = vmatpush.msra.mxu3 %v2279_v8  ;;  %1451 = vmatpush.msrb.mxu1 %v2252_v16  ;;  %v2306_v8 = vld [vmem:[%s3706_s4 + $0x318] sm:$0xff]  ;;  %v2295_v16 = vld [vmem:[%s3706_s4 + $0x2c0] sm:$0xff] }
 0x1b4   : > { %1543 = vmatpush.msra.mxu2 %v2270_v29  ;;  %1433 = vmatpush.msrb.mxu0 %v2241_v36 }
 0x1b5   : > { %1516 = vmatpush.msra.mxu3 %v2277_v12  ;;  %1452 = vmatpush.msrb.mxu1 %v2250_v13 }
 0x1b6   : > { %1544 = vmatpush.msra.mxu2 %v2268_v33  ;;  %1434 = vmatpush.msrb.mxu0 %v2239_v38 }
 0x1b7   : > { %1517 = vmatpush.msra.mxu3 %v2275_v18  ;;  %1453 = vmatpush.msrb.mxu1 %v2248_v27  ;;  %v2300_v18 = vld [vmem:[%s3706_s4 + $0x2e8] sm:$0xff] }
 0x1b9   : > { %1518 = vmatpush.msra.mxu3 %v2273_v22  ;;  %1454 = vmatpush.msrb.mxu1 %v2246_v31  ;;  %v2296_v22 = vld [vmem:[%s3706_s4 + $0x2c8] sm:$0xff] }
 0x1bb   : > { %1519 = vmatpush.msra.mxu3 %v2271_v19  ;;  %1455 = vmatpush.msrb.mxu1 %v2244_v35 }
 0x1bd   : > { %1520 = vmatpush.msra.mxu3 %v2269_v28  ;;  %1456 = vmatpush.msrb.mxu1 %v2242_v37 }
 0x1bf   : > { %1521 = vmatpush.msra.mxu3 %v2267_v32  ;;  %1457 = vmatpush.msrb.mxu1 %v2240_v39 }
 0x1fe   : > { %v1119_v41 = vpop.f32.mrf.mxu0 }
 0x204   : > { %v1187_v42 = vpop.f32.mrf.mxu2 }
 0x206   : > { %v1122_v48 = vpop.f32.mrf.mxu0 }
 0x20c   : > { %v1190_v49 = vpop.f32.mrf.mxu2 }
 0x227   : > { %v1142_v40 = vpop.f32.mrf.mxu1 }
 0x228   : > { %v1143_v44 = vadd.f32 %v1142_v40, %v1119_v41 }
 0x22d   : > { %v1210_v43 = vpop.f32.mrf.mxu3 }
 0x22e   : > { %v1211_v45 = vadd.f32 %v1210_v43, %v1187_v42 }
 0x22f   : > { %v1145_v47 = vpop.f32.mrf.mxu1 }
 0x230   : > { %v3293_v46 = vmax.f32 %v1143_v44, %v1211_v45  ;;  %v1146_v51 = vadd.f32 %v1145_v47, %v1122_v48  ;;  %v1770_v47 = vld [vmem:[%s3709_s7 + $0x78] sm:$0xff]  ;;  %v1642_v48 = vld [vmem:[%s3707_s5] sm:$0x3] }
 0x232   : > { %2234 = vmatmul.msk.f32.vlgmr.msrb.gmra.mxu3 %vm1269_vm5, %v3293_v46  ;;  %2237 = vmatmul.msk.f32.vlgmr.msrb.gmra.mxu2 %vm1269_vm5, %v3293_v46  ;;  %v1266_v54 = vrot.slane %v3293_v46, 1  ;;  %v1493_v62 = vrot.slane %v3293_v46, 3  ;;  %v1406_v9 = vrot.slane %v3293_v46, 2  ;;  %v1579_v24 = vrot.slane %v3293_v46, 4 }
 0x235   : > { %v1213_v50 = vpop.f32.mrf.mxu3 }
 0x236   : > { %v1214_v52 = vadd.f32 %v1213_v50, %v1190_v49  ;;  %v1769_v49 = vld [vmem:[%s3709_s7 + $0x70] sm:$0xff] }
 0x238   : > { %v3299_v53 = vmax.f32 %v1146_v51, %v1214_v52 }
 0x23a   : > { %2235 = vmatmul.msk.f32.gmra.mxu3 %vm1269_vm5, %v3299_v53  ;;  %2238 = vmatmul.msk.f32.gmra.mxu2 %vm1269_vm5, %v3299_v53  ;;  %v1267_v55 = vrot.slane %v3299_v53, 1  ;;  %v1494_v59 = vrot.slane %v3299_v53, 3  ;;  %v1407_v6 = vrot.slane %v3299_v53, 2  ;;  %v1580_v23 = vrot.slane %v3299_v53, 4 }
 0x23c   : > { %v1268_v58 = vsel %vm1265_vm6, %v1266_v54, %v1267_v55  ;;  %v1495_v1 = vsel %vm1492_vm7, %v1493_v62, %v1494_v59  ;;  %v1408_v12 = vsel %vm1405_vm8, %v1406_v9, %v1407_v6  ;;  %v1581_v13 = vsel %vm962_vm2, %v1579_v24, %v1580_v23  ;;  %v1774_v9 = vld [vmem:[%s3709_s7 + $0x98] sm:$0xff]  ;;  %v1763_v24 = vld [vmem:[%s3709_s7 + $0x40] sm:$0xff] }
 0x23d   : > { %2228 = vmatmul.msk.f32.vlgmr.msra.gmra.mxu0 %vm1269_vm5, %v1268_v58  ;;  %2231 = vmatmul.msk.f32.vlgmr.msra.gmra.mxu1 %vm1269_vm5, %v1268_v58 }
 0x23e   : > { %2317 = vmatpush.msk.msra.mxu0 %vm962_vm2, %v2315_v56  ;;  %2320 = vmatpush.msk.msra.mxu1 %vm962_vm2, %v2316_v57 }
 0x240   : > { %1598 = vmatpush.msra.mxu0 %v2313_v60  ;;  %1621 = vmatpush.msra.mxu1 %v2314_v61 }
 0x242   : > { %2290 = vmatmul.msk.f32.vlgmr.msra.gmra.mxu3 %vm1269_vm5, %v1495_v1  ;;  %2293 = vmatmul.msk.f32.vlgmr.msra.gmra.mxu2 %vm1269_vm5, %v1495_v1  ;;  %v1645_v1 = vperm.slane %v1642_v48, 1 }
 0x243   : > { %1599 = vmatpush.msra.mxu0 %v2311_v63  ;;  %1622 = vmatpush.msra.mxu1 %v2312_v0 }
 0x245   : > { %2229 = vmatmul.msk.f32.gmra.mxu0 %vm1269_vm5, %v1267_v55  ;;  %2232 = vmatmul.msk.f32.gmra.mxu1 %vm1269_vm5, %v1267_v55  ;;  %v1644_v55 = vperm.slane %v1642_v48, 0  ;;  %v2333_v48 = vld [vmem:[%s3709_s7 + $0xa0] sm:$0xff] }
 0x246   : > { %1600 = vmatpush.msra.mxu0 %v2309_v2  ;;  %1623 = vmatpush.msra.mxu1 %v2310_v3 }
 0x248   : > { %1601 = vmatpush.msra.mxu0 %v2307_v4  ;;  %1624 = vmatpush.msra.mxu1 %v2308_v5 }
 0x24a   : > { %2291 = vmatmul.msk.f32.gmra.mxu3 %vm1269_vm5, %v1494_v59  ;;  %2294 = vmatmul.msk.f32.gmra.mxu2 %vm1269_vm5, %v1494_v59 }
 0x24b   : > { %1602 = vmatpush.msra.mxu0 %v2305_v7  ;;  %1625 = vmatpush.msra.mxu1 %v2306_v8  ;;  %v1656_v7 = vld [vmem:[%s3708_s6] sm:$0x1f]  ;;  %v2327_v8 = vld [vmem:[%s3708_s6 + $0x8] sm:$0x1f] }
 0x24d   : > { %2262 = vmatmul.msk.f32.vlgmr.msrb.gmra.mxu0 %vm1269_vm5, %v1408_v12  ;;  %2265 = vmatmul.msk.f32.vlgmr.msrb.gmra.mxu1 %vm1269_vm5, %v1408_v12 }
 0x24e   : > { %1603 = vmatpush.msra.mxu0 %v2303_v10  ;;  %1626 = vmatpush.msra.mxu1 %v2304_v11  ;;  %v1773_v11 = vld [vmem:[%s3709_s7 + $0x90] sm:$0xff] }
 0x250   : > { %1604 = vmatpush.msra.mxu0 %v2301_v14  ;;  %1627 = vmatpush.msra.mxu1 %v2302_v15  ;;  %v1772_v14 = vld [vmem:[%s3709_s7 + $0x88] sm:$0xff]  ;;  %v1771_v15 = vld [vmem:[%s3709_s7 + $0x80] sm:$0xff] }
 0x252   : > { %1605 = vmatpush.msra.mxu0 %v2299_v17  ;;  %1628 = vmatpush.msra.mxu1 %v2300_v18  ;;  %v2348_v17 = vld [vmem:[%s3709_s7 + $0x118] sm:$0xff]  ;;  %v2347_v18 = vld [vmem:[%s3709_s7 + $0x110] sm:$0xff] }
 0x254   : > { %1606 = vmatpush.msra.mxu0 %v2297_v20  ;;  %1629 = vmatpush.msra.mxu1 %v2298_v21  ;;  %v1768_v20 = vld [vmem:[%s3709_s7 + $0x68] sm:$0xff]  ;;  %v1767_v21 = vld [vmem:[%s3709_s7 + $0x60] sm:$0xff] }
 0x255   : > { %2263 = vmatmul.msk.f32.gmra.mxu0 %vm1269_vm5, %v1407_v6  ;;  %2266 = vmatmul.msk.f32.gmra.mxu1 %vm1269_vm5, %v1407_v6 }
 0x256   : > { %1607 = vmatpush.msra.mxu0 %v2295_v16  ;;  %1630 = vmatpush.msra.mxu1 %v2296_v22  ;;  %v1766_v16 = vld [vmem:[%s3709_s7 + $0x58] sm:$0xff]  ;;  %v1765_v22 = vld [vmem:[%s3709_s7 + $0x50] sm:$0xff] }
 0x258   : > { %1779 = vmatpush.msrb.mxu0 %v1770_v47  ;;  %v2334_v47 = vld [vmem:[%s3709_s7 + $0xa8] sm:$0xff] }
 0x25a   : > { %1780 = vmatpush.msrb.mxu0 %v1769_v49 }
 0x25c   : > { %1781 = vmatpush.msrb.mxu0 %v1768_v20 }
 0x25d   : > { %2318 = vmatmul.msk.f32.vlgmr.msra.gmra.mxu0 %vm1269_vm5, %v1581_v13  ;;  %2321 = vmatmul.msk.f32.vlgmr.msra.gmra.mxu1 %vm1269_vm5, %v1581_v13  ;;  %v1762_v13 = vld [vmem:[%s3709_s7 + $0x38] sm:$0xff] }
 0x25e   : > { %1782 = vmatpush.msrb.mxu0 %v1767_v21  ;;  %v1930_v21 = vld [vmem:[%s3712_s10 + $0x28] sm:$0xff] }
 0x260   : > { %1783 = vmatpush.msrb.mxu0 %v1766_v16 }
 0x262   : > { %1784 = vmatpush.msrb.mxu0 %v1765_v22 }
 0x265   : > { %2319 = vmatmul.msk.f32.gmra.mxu0 %vm1269_vm5, %v1580_v23  ;;  %2322 = vmatmul.msk.f32.gmra.mxu1 %vm1269_vm5, %v1580_v23  ;;  %v1764_v23 = vld [vmem:[%s3709_s7 + $0x48] sm:$0xff] }
 0x266   : > { %1785 = vmatpush.msrb.mxu0 %v1764_v23  ;;  %v1929_v23 = vld [vmem:[%s3712_s10 + $0x20] sm:$0xff] }
 0x268   : > { %1786 = vmatpush.msrb.mxu0 %v1763_v24 }
 0x26a   : > { %1787 = vmatpush.msrb.mxu0 %v1762_v13  ;;  %v1928_v13 = vld [vmem:[%s3712_s10 + $0x18] sm:$0xff] }
 0x2b5   : > { %v1353_v26 = vpop.f32.mrf.mxu3  ;;  %v1376_v27 = vpop.f32.mrf.mxu2 }
 0x2ba   : > { %v1297_v19 = vpop.f32.mrf.mxu0  ;;  %v1320_v25 = vpop.f32.mrf.mxu1 }
 0x2bb   : > { %v1354_v38 = vadd.f32 %v1353_v26, %v1297_v19  ;;  %v1377_v44 = vadd.f32 %v1376_v27, %v1320_v25  ;;  %v1761_v19 = vld [vmem:[%s3709_s7 + $0x30] sm:$0xff]  ;;  %v1760_v25 = vld [vmem:[%s3709_s7 + $0x28] sm:$0xff]  ;;  %v1759_v26 = vld [vmem:[%s3709_s7 + $0x20] sm:$0xff] }
 0x2bc   : > { %1788 = vmatpush.msrb.mxu0 %v1761_v19  ;;  %v1758_v27 = vld [vmem:[%s3709_s7 + $0x18] sm:$0xff] }
 0x2bd   : > { %v1356_v32 = vpop.f32.mrf.mxu3  ;;  %v1379_v33 = vpop.f32.mrf.mxu2 }
 0x2be   : > { %1789 = vmatpush.msrb.mxu0 %v1760_v25 }
 0x2c0   : > { %1790 = vmatpush.msrb.mxu0 %v1759_v26 }
 0x2c2   : > { %v1300_v28 = vpop.f32.mrf.mxu0  ;;  %v1323_v29 = vpop.f32.mrf.mxu1  ;;  %1791 = vmatpush.msrb.mxu0 %v1758_v27 }
 0x2c3   : > { %v1357_v41 = vadd.f32 %v1356_v32, %v1300_v28  ;;  %v1380_v42 = vadd.f32 %v1379_v33, %v1323_v29  ;;  %v1757_v28 = vld [vmem:[%s3709_s7 + $0x10] sm:$0xff]  ;;  %v2346_v29 = vld [vmem:[%s3709_s7 + $0x108] sm:$0xff]  ;;  %v2344_v32 = vld [vmem:[%s3709_s7 + $0xf8] sm:$0xff] }
 0x2c4   : > { %1792 = vmatpush.msrb.mxu0 %v1757_v28  ;;  %v1755_v33 = vld [vmem:[%s3709_s7] sm:$0xff]  ;;  %v1927_v28 = vld [vmem:[%s3712_s10 + $0x10] sm:$0xff] }
 0x2c5   : > { %v1523_v36 = vpop.f32.mrf.mxu3  ;;  %v1546_v37 = vpop.f32.mrf.mxu2 }
 0x2ca   : > { %v1436_v30 = vpop.f32.mrf.mxu0  ;;  %v1459_v31 = vpop.f32.mrf.mxu1 }
 0x2cb   : > { %v1465_v43 = vadd.f32 %v1436_v30, %v1354_v38  ;;  %v1466_v50 = vadd.f32 %v1459_v31, %v1377_v44  ;;  %v2345_v30 = vld [vmem:[%s3709_s7 + $0x100] sm:$0xff]  ;;  %v1756_v31 = vld [vmem:[%s3709_s7 + $0x8] sm:$0xff]  ;;  %v2339_v38 = vld [vmem:[%s3709_s7 + $0xd0] sm:$0xff] }
 0x2cc   : > { %1793 = vmatpush.msrb.mxu0 %v1756_v31  ;;  %v2349_v44 = vld [vmem:[%s3709_s7 + $0x120] sm:$0xff]  ;;  %v1978_v31 = vld [vmem:[%s3714_s12 + $0x78] sm:$0xff] }
 0x2cd   : > { %v1552_v51 = vadd.f32 %v1523_v36, %v1465_v43  ;;  %v1526_v52 = vpop.f32.mrf.mxu3  ;;  %v1549_v53 = vpop.f32.mrf.mxu2  ;;  %v1553_v60 = vadd.f32 %v1546_v37, %v1466_v50  ;;  %v2341_v36 = vld [vmem:[%s3709_s7 + $0xe0] sm:$0xff]  ;;  %v2340_v37 = vld [vmem:[%s3709_s7 + $0xd8] sm:$0xff] }
 0x2ce   : > { %1794 = vmatpush.msrb.mxu0 %v1755_v33  ;;  %v2337_v43 = vld [vmem:[%s3709_s7 + $0xc0] sm:$0xff]  ;;  %v1976_v33 = vld [vmem:[%s3714_s12 + $0x68] sm:$0xff] }
 0x2d0   : > { %1980 = vmatpush.msra.mxu0 %v1978_v31 }
 0x2d2   : > { %v1439_v34 = vpop.f32.mrf.mxu0  ;;  %v1462_v35 = vpop.f32.mrf.mxu1 }
 0x2d3   : > { %v1467_v45 = vadd.f32 %v1439_v34, %v1357_v41  ;;  %v1468_v46 = vadd.f32 %v1462_v35, %v1380_v42  ;;  %v2343_v34 = vld [vmem:[%s3709_s7 + $0xf0] sm:$0xff]  ;;  %v2342_v35 = vld [vmem:[%s3709_s7 + $0xe8] sm:$0xff] }
 0x2d4   : > { %v2338_v41 = vld [vmem:[%s3709_s7 + $0xc8] sm:$0xff] }
 0x2d5   : > { %v1554_v56 = vadd.f32 %v1526_v52, %v1467_v45  ;;  %v1555_v57 = vadd.f32 %v1549_v53, %v1468_v46  ;;  %v2350_v42 = vld [vmem:[%s3709_s7 + $0x128] sm:$0xff]  ;;  %v2336_v45 = vld [vmem:[%s3709_s7 + $0xb8] sm:$0xff]  ;;  %v2335_v46 = vld [vmem:[%s3709_s7 + $0xb0] sm:$0xff] }
 0x2da   : > { %v1609_v39 = vpop.f32.mrf.mxu0  ;;  %v1632_v40 = vpop.f32.mrf.mxu1 }
 0x2db   : > { %v1638_v54 = vadd.f32 %v1609_v39, %v1552_v51  ;;  %v1639_v0 = vadd.f32 %v1632_v40, %v1553_v60  ;;  %v2352_v39 = vld [vmem:[%s3709_s7 + $0x138] sm:$0xff]  ;;  %v2351_v40 = vld [vmem:[%s3709_s7 + $0x130] sm:$0xff]  ;;  %v1893_v60 = vld [vmem:[%s3710_s8 + $0x20] sm:$0xff] }
 0x2dd   : > { %v1648_v63 = vadd.f32 %v1644_v55, %v1638_v54  ;;  %v1649_v6 = vadd.f32 %v1645_v1, %v1639_v0  ;;  %v1889_v0 = vld [vmem:[%s3710_s8] sm:$0xff] }
 0x2df   : > { %v1652_v5 = vmax.f32 %v1648_v63, 0.0  ;;  %v1653_v12 = vmax.f32 %v1649_v6, 0.0  ;;  %v1890_v63 = vld [vmem:[%s3710_s8 + $0x8] sm:$0xff]  ;;  %v1936_v6 = vld [vmem:[%s3712_s10 + $0x58] sm:$0xff] }
 0x2e2   : > { %v1612_v58 = vpop.f32.mrf.mxu0  ;;  %v1635_v59 = vpop.f32.mrf.mxu1 }
 0x2e3   : > { %v1640_v61 = vadd.f32 %v1612_v58, %v1554_v56  ;;  %v1641_v62 = vadd.f32 %v1635_v59, %v1555_v57  ;;  %v1897_v56 = vld [vmem:[%s3710_s8 + $0x40] sm:$0xff]  ;;  %v1896_v57 = vld [vmem:[%s3710_s8 + $0x38] sm:$0xff]  ;;  %v1895_v58 = vld [vmem:[%s3710_s8 + $0x30] sm:$0xff] }
 0x2e4   : > { %v1894_v59 = vld [vmem:[%s3710_s8 + $0x28] sm:$0xff] }
 0x2e5   : > { %v1650_v2 = vadd.f32 %v1644_v55, %v1640_v61  ;;  %v1651_v4 = vadd.f32 %v1645_v1, %v1641_v62  ;;  %v1898_v55 = vld [vmem:[%s3710_s8 + $0x48] sm:$0xff]  ;;  %v1892_v61 = vld [vmem:[%s3710_s8 + $0x18] sm:$0xff]  ;;  %v1891_v62 = vld [vmem:[%s3710_s8 + $0x10] sm:$0xff] }
 0x2e6   : > { %1910 = vmatpush.msrb.mxu1 %v1898_v55  ;;  %v1940_v1 = vld [vmem:[%s3712_s10 + $0x78] sm:$0xff]  ;;  %v1979_v55 = vld [vmem:[%s3715_s13] sm:$0x1] }
 0x2e7   : > { %v1654_v3 = vmax.f32 %v1650_v2, 0.0  ;;  %v1655_v10 = vmax.f32 %v1651_v4, 0.0  ;;  %v1939_v2 = vld [vmem:[%s3712_s10 + $0x70] sm:$0xff]  ;;  %v1937_v4 = vld [vmem:[%s3712_s10 + $0x60] sm:$0xff] }
 0x2e8   : > { %1911 = vmatpush.msrb.mxu1 %v1897_v56 }
 0x2e9   : > { %2323 = vmatpush.msk.msrb.mxu3 %vm1661_vm9, %v1654_v3  ;;  %2328 = vmatpush.msk.msrb.mxu2 %vm1661_vm9, %v1654_v3  ;;  %v1938_v3 = vld [vmem:[%s3712_s10 + $0x68] sm:$0xff] }
 0x2ea   : > { %1912 = vmatpush.msrb.mxu1 %v1896_v57 }
 0x2eb   : > { %1683 = vmatpush.msrb.mxu3 %v1652_v5  ;;  %1728 = vmatpush.msrb.mxu2 %v1652_v5 }
 0x2ec   : > { %2324 = vmatmul.msk.f32.vlgmr.msrb.gmra.mxu3 %vm1657_vm10, %v1656_v7  ;;  %2329 = vmatmul.msk.f32.vlgmr.msrb.gmra.mxu2 %vm1657_vm10, %v2327_v8 }
 0x2ed   : > { %2325 = vmatpush.msk.msra.mxu3 %vm1661_vm9, %v1655_v10  ;;  %1811 = vmatpush.msra.mxu2 %v1774_v9  ;;  %v1933_v9 = vld [vmem:[%s3712_s10 + $0x40] sm:$0xff] }
 0x2ee   : > { %1913 = vmatpush.msrb.mxu1 %v1895_v58 }
 0x2ef   : > { %1703 = vmatpush.msra.mxu3 %v1653_v12  ;;  %1812 = vmatpush.msra.mxu2 %v1773_v11 }
 0x2f0   : > { %1914 = vmatpush.msrb.mxu1 %v1894_v59 }
 0x2f1   : > { %2330 = vmatpush.msk.msrb.mxu3 %vm1661_vm9, %v1655_v10  ;;  %1813 = vmatpush.msra.mxu2 %v1772_v14  ;;  %v1932_v14 = vld [vmem:[%s3712_s10 + $0x38] sm:$0xff] }
 0x2f2   : > { %1915 = vmatpush.msrb.mxu1 %v1893_v60 }
 0x2f3   : > { %1748 = vmatpush.msrb.mxu3 %v1653_v12  ;;  %1814 = vmatpush.msra.mxu2 %v1771_v15 }
 0x2f4   : > { %2326 = vmatmul.msk.f32.vlgmr.msra.gmra.mxu3 %vm1657_vm10, %v1656_v7  ;;  %1916 = vmatpush.msrb.mxu1 %v1892_v61  ;;  %v1935_v7 = vld [vmem:[%s3712_s10 + $0x50] sm:$0xff] }
 0x2f5   : > { %1840 = vmatpush.msrb.mxu2 %v2348_v17  ;;  %1872 = vmatpush.msra.mxu3 %v2352_v39  ;;  %v1970_v39 = vld [vmem:[%s3714_s12 + $0x38] sm:$0xff] }
 0x2f6   : > { %1917 = vmatpush.msrb.mxu1 %v1891_v62 }
 0x2f7   : > { %1841 = vmatpush.msrb.mxu2 %v2347_v18  ;;  %1873 = vmatpush.msra.mxu3 %v2351_v40  ;;  %v1931_v18 = vld [vmem:[%s3712_s10 + $0x30] sm:$0xff] }
 0x2f8   : > { %1918 = vmatpush.msrb.mxu1 %v1890_v63  ;;  %v1969_v40 = vld [vmem:[%s3714_s12 + $0x30] sm:$0xff] }
 0x2f9   : > { %1842 = vmatpush.msrb.mxu2 %v2346_v29  ;;  %1874 = vmatpush.msra.mxu3 %v2350_v42  ;;  %v1926_v29 = vld [vmem:[%s3712_s10 + $0x8] sm:$0xff]  ;;  %v1967_v42 = vld [vmem:[%s3714_s12 + $0x20] sm:$0xff] }
 0x2fa   : > { %1919 = vmatpush.msrb.mxu1 %v1889_v0 }
 0x2fb   : > { %1843 = vmatpush.msrb.mxu2 %v2345_v30  ;;  %1875 = vmatpush.msra.mxu3 %v2349_v44  ;;  %v1925_v30 = vld [vmem:[%s3712_s10] sm:$0xff] }
 0x2fc   : > { %2331 = vmatmul.msk.f32.vlgmr.msrb.gmra.mxu3 %vm1657_vm10, %v2327_v8  ;;  %v1934_v8 = vld [vmem:[%s3712_s10 + $0x48] sm:$0xff]  ;;  %v1899_v44 = vld [vmem:[%s3711_s9] sm:$0x1] }
 0x2fd   : > { %1844 = vmatpush.msrb.mxu2 %v2344_v32  ;;  %1942 = vmatpush.msrb.mxu3 %v1940_v1  ;;  %v1977_v32 = vld [vmem:[%s3714_s12 + $0x70] sm:$0xff] }
 0x2fe   : > { %1981 = vmatpush.msra.mxu0 %v1977_v32 }
 0x2ff   : > { %1845 = vmatpush.msrb.mxu2 %v2343_v34  ;;  %1943 = vmatpush.msrb.mxu3 %v1939_v2  ;;  %v1975_v34 = vld [vmem:[%s3714_s12 + $0x60] sm:$0xff] }
 0x300   : > { %1982 = vmatpush.msra.mxu0 %v1976_v33 }
 0x301   : > { %1846 = vmatpush.msrb.mxu2 %v2342_v35  ;;  %1944 = vmatpush.msrb.mxu3 %v1938_v3  ;;  %v1974_v35 = vld [vmem:[%s3714_s12 + $0x58] sm:$0xff] }
 0x302   : > { %1983 = vmatpush.msra.mxu0 %v1975_v34 }
 0x303   : > { %1847 = vmatpush.msrb.mxu2 %v2341_v36  ;;  %1945 = vmatpush.msrb.mxu3 %v1937_v4  ;;  %v1973_v36 = vld [vmem:[%s3714_s12 + $0x50] sm:$0xff] }
 0x304   : > { %1984 = vmatpush.msra.mxu0 %v1974_v35 }
 0x305   : > { %1848 = vmatpush.msrb.mxu2 %v2340_v37  ;;  %1946 = vmatpush.msrb.mxu3 %v1936_v6  ;;  %v1972_v37 = vld [vmem:[%s3714_s12 + $0x48] sm:$0xff] }
 0x306   : > { %1985 = vmatpush.msra.mxu0 %v1973_v36 }
 0x307   : > { %1849 = vmatpush.msrb.mxu2 %v2339_v38  ;;  %1947 = vmatpush.msrb.mxu3 %v1935_v7  ;;  %v1971_v38 = vld [vmem:[%s3714_s12 + $0x40] sm:$0xff] }
 0x308   : > { %1986 = vmatpush.msra.mxu0 %v1972_v37 }
 0x309   : > { %1850 = vmatpush.msrb.mxu2 %v2338_v41  ;;  %1948 = vmatpush.msrb.mxu3 %v1934_v8  ;;  %v1968_v41 = vld [vmem:[%s3714_s12 + $0x28] sm:$0xff] }
 0x30a   : > { %1987 = vmatpush.msra.mxu0 %v1971_v38 }
 0x30b   : > { %1851 = vmatpush.msrb.mxu2 %v2337_v43  ;;  %1949 = vmatpush.msrb.mxu3 %v1933_v9  ;;  %v1966_v43 = vld [vmem:[%s3714_s12 + $0x18] sm:$0xff] }
 0x30c   : > { %1988 = vmatpush.msra.mxu0 %v1970_v39 }
 0x30d   : > { %1852 = vmatpush.msrb.mxu2 %v2336_v45  ;;  %1950 = vmatpush.msrb.mxu3 %v1932_v14 }
 0x30e   : > { %1989 = vmatpush.msra.mxu0 %v1969_v40 }
 0x30f   : > { %1853 = vmatpush.msrb.mxu2 %v2335_v46  ;;  %1951 = vmatpush.msrb.mxu3 %v1931_v18 }
 0x310   : > { %1990 = vmatpush.msra.mxu0 %v1968_v41 }
 0x311   : > { %1854 = vmatpush.msrb.mxu2 %v2334_v47  ;;  %1952 = vmatpush.msrb.mxu3 %v1930_v21 }
 0x312   : > { %1991 = vmatpush.msra.mxu0 %v1967_v42 }
 0x313   : > { %1855 = vmatpush.msrb.mxu2 %v2333_v48  ;;  %1953 = vmatpush.msrb.mxu3 %v1929_v23  ;;  %v1965_v48 = vld [vmem:[%s3714_s12 + $0x10] sm:$0xff] }
 0x314   : > { %1992 = vmatpush.msra.mxu0 %v1966_v43 }
 0x315   : > { %1954 = vmatpush.msrb.mxu3 %v1928_v13 }
 0x316   : > { %1993 = vmatpush.msra.mxu0 %v1965_v48 }
 0x317   : > { %1955 = vmatpush.msrb.mxu3 %v1927_v28 }
 0x319   : > { %1956 = vmatpush.msrb.mxu3 %v1926_v29 }
 0x31b   : > { %1957 = vmatpush.msrb.mxu3 %v1925_v30 }
 0x36f   : > { %v1685_v49 = vpop.f32.mrf.mxu3  ;;  %v1730_v50 = vpop.f32.mrf.mxu2 }
 0x370   : > { %v1753_v51 = vmax.f32 %v1685_v49, %v1730_v50  ;;  %v1964_v49 = vld [vmem:[%s3714_s12 + $0x8] sm:$0xff]  ;;  %v1963_v50 = vld [vmem:[%s3714_s12] sm:$0xff] }
 0x371   : > { %1994 = vmatpush.msra.mxu0 %v1964_v49 }
 0x372   : > { %1795 = vmatmul.f32.vlgmr.msrb.gmra.mxu0 %v1753_v51 }
 0x373   : > { %1995 = vmatpush.msra.mxu0 %v1963_v50 }
 0x377   : > { %v1705_v52 = vpop.f32.mrf.mxu3 }
 0x37f   : > { %v1750_v53 = vpop.f32.mrf.mxu3 }
 0x380   : > { %v1754_v54 = vmax.f32 %v1705_v52, %v1750_v53 }
 0x382   : > { %2332 = vmatmul.msk.f32.vlgmr.msra.gmra.mxu2 %vm1775_vm11, %v1754_v54  ;;  %2353 = vmatmul.msk.f32.vlgmr.msra.gmra.mxu3 %vm1775_vm11, %v1754_v54 }
 0x38a   : > { %1856 = vmatmul.f32.vlgmr.msrb.gmra.mxu2 %v1753_v51  ;;  %v1941_v51 = vld [vmem:[%s3713_s11] sm:$0x1] }
 0x3ef   : > { %v1796_v10 = vpop.f32.mrf.mxu0 }
 0x405   : > { %v1816_v5 = vpop.f32.mrf.mxu2  ;;  %v1877_v12 = vpop.f32.mrf.mxu3 }
 0x406   : > { %v1817_v15 = vadd.f32 %v1816_v5, %v1796_v10 }
 0x40d   : > { %v1857_v11 = vpop.f32.mrf.mxu2 }
 0x40e   : > { %v1878_v17 = vadd.f32 %v1877_v12, %v1857_v11 }
 0x410   : > { %v1880_v20 = vmax.f32 %v1817_v15, %v1878_v17 }
 0x412   : > { %v1882_v16 = vsel %vm1881_vm12, %v1880_v20, 0.0 }
 0x413   : > { %v1883_v22 = vrot.slane %v1882_v16, 4 }
 0x415   : > { %v1884_v24 = vadd.f32 %v1883_v22, %v1882_v16 }
 0x417   : > { %v1885_v19 = vrot.slane %v1884_v24, 2 }
 0x419   : > { %v1886_v25 = vadd.f32 %v1885_v19, %v1884_v24 }
 0x41b   : > { %v1887_v26 = vrot.slane %v1886_v25, 1 }
 0x41d   : > { %v1888_v27 = vadd.f32 %v1887_v26, %v1886_v25 }
 0x41f   : > { %2354 = vmatmul.msk.f32.vlgmr.msrb.gmra.mxu1 %vm1900_vm13, %v1888_v27 }
 0x49c   : > { %v1921_v45 = vpop.f32.mrf.mxu1 }
 0x49d   : > { %v1922_v46 = vadd.f32 %v1921_v45, %v1899_v44 }
 0x49f   : > { %v1924_v47 = vmax.f32 %v1922_v46, 0.0 }
 0x4a1   : > { %1958 = vmatmul.f32.vlgmr.msrb.gmra.mxu3 %v1924_v47 }
 0x524   : > { %v1959_v52 = vpop.f32.mrf.mxu3 }
 0x525   : > { %v1960_v53 = vadd.f32 %v1959_v52, %v1941_v51 }
 0x527   : > { %v1962_v54 = vmax.f32 %v1960_v53, 0.0 }
 0x529   : > { %1996 = vmatmul.f32.vlgmr.msra.gmra.mxu0 %v1962_v54 }
 0x5a6   : > { %v1997_v56 = vpop.f32.mrf.mxu0 }
 0x5a7   : > { %v1998_v57 = vadd.f32 %v1997_v56, %v1979_v55 }
 0x5a9   : > { %2001 = vst.msk [vmem:[%s459_s27] sm:$0x1] %vm2000_vm14, %v1998_v57 }
 0x5aa   : > { %2433 = shalt.err (!%p2430_p3)
}
 0x5ab   : > { %2367 = dma.vmem_to_hbm [thread:$0]  (%p2583_p5), %s2014_s15, 16, %s2016_s28, %s2003_s21  }
 0x5ac PF: > { %p2373_p4 = scmp.ge.s32.totalorder %s2468_s16, 2  ;;  %s2027_s26 = sand.u32 1, %s2456_s29  }
 0x5ad   : > { %s2028_s27 = scalar_lea.sflag [#allocation3], %s2027_s26 }
 0x5ae   : > { %p2370_p7 = pnand %p2373_p4, %p2587_p6 }
 0x5b0   : > { %p2371_p8 = pneg %p2370_p7 }
 0x5b2   : > { %2451 = dma.done.wait (%p2371_p8), %s2028_s27, 16  }
 0x5b3   : > { %2453 = vsyncadd (%p2371_p8), %s2028_s27, 4294967280  ;;  %s3730_s16 = sld [smem:[#allocation6_spill]]  ;;  %s3733_s29 = smov %s2460_s30 }
 0x5b4   : > { %s3731_s0 = sld [smem:[#allocation5_spill]] }
 0x5b5   : > { %s3732_s15 = sld [smem:[#allocation7_spill]] }
 0x5b9   : > { %p24_p9 = scmp.ge.s32.totalorder %s3730_s16, 4  }
 0x5ba   : > { %s3734_s30 = smov %s3731_s0 }
 0x5bb   :  { %26 = sbr.rel (!%p24_p9) target bundleno = 5 (0x5), region = 123 }
 0x5c0   :  { %2033 = vsyncpa [#allocation3], 1 }
 0x5c1   :  { %2035 = vsyncpa [#allocation3 + $0x1], 1 }

</bundles_post_ra>
